<compile_context>
chip_gen: v6e
topology: v6e:2x2x1
jax: 0.10.0
libtpu: 0.0.40
codegen_flags: <defaults>
</compile_context>

<pallas_src>
import functools

import jax
import jax.numpy as jnp
from jax.experimental import pallas as pl
from jax.experimental.pallas import tpu as pltpu


def _spconv_kernel(w_ref, b_ref, x_ref, o_ref, *, cin, cout_r, kh, kw, th, wp):
    """Fused im2col + valid conv + bias on the VPU.

    w_ref : SMEM (cout_r*cin*kh*kw,) f32  -- weights, flattened OIHW order
    b_ref : SMEM (cout_r,)           f32  -- bias
    x_ref : VMEM (cin, th + kh - 1, W)    -- input rows for this (b, h) tile
    o_ref : VMEM (cout_r, th, wp)         -- conv output tile (NCHW layout)
    """
    # Hoist the cin*kh*kw shifted im2col windows: each (dh, dw) offset is a
    # sublane/lane relayout, so compute it once instead of cout_r times.
    xs = []
    for ci in range(cin):
        xc = x_ref[ci, :, :].astype(jnp.float32)           # (th + kh - 1, W)
        for dh in range(kh):
            for dw in range(kw):
                xs.append(xc[dh:dh + th, dw:dw + wp])      # (th, wp) window

    # One live accumulator at a time; bias fused into its init; the conv is a
    # chain of scalar-broadcast FMAs on the VPU (weights are static SMEM reads).
    kvol = cin * kh * kw
    for o in range(cout_r):
        acc = jnp.full((th, wp), b_ref[o], dtype=jnp.float32)
        base = o * kvol
        for t in range(kvol):
            acc = acc + xs[t] * w_ref[base + t]
        o_ref[o, :, :] = acc.astype(o_ref.dtype)


def sp_conv_transpose2d(x_nchw, weight, bias, kernel_size, r):
    """Pallas implementation of SPConvTranspose2d.forward.

    x_nchw : (B, Cin, H, W)          float32
    weight : (Cout*r, Cin, kh, kw)   float32  (PyTorch Conv2d OIHW layout)
    bias   : (Cout*r,)               float32
    """
    kh, kw = kernel_size
    B, Cin, H, W = x_nchw.shape
    CoutR = weight.shape[0]
    Cout = CoutR // r
    Hp, Wp = H - kh + 1, W - kw + 1               # VALID conv, stride (1, 1)

    # ---- row-tile selection (over the output H axis) ------------------------
    if kh > 1:
        # Overlapping (halo) H-tiles are not expressible with plain BlockSpecs;
        # dbaiat always uses kh == 1, so fall back to a single full-H tile.
        # TODO(synk): manual-DMA halo tiling along H for kh > 1 if ever needed.
        Th = Hp
    else:
        lane_pad = lambda n: ((n + 127) // 128) * 128
        # double-buffered in/out blocks, lane-padded to 128, ~8 MiB budget
        per_row = (Cin * lane_pad(W) + CoutR * lane_pad(Wp)) * 4 * 2
        Th = max(8, min(Hp, (8 * 1024 * 1024) // max(per_row, 1), 1024))
        Th = min(Hp, ((Th + 7) // 8) * 8)          # multiple of 8, or full Hp
    nH = pl.cdiv(Hp, Th)

    wflat = weight.astype(jnp.float32).reshape(-1)  # OIHW order, flat -> SMEM
    bflat = bias.astype(jnp.float32)

    kern = functools.partial(_spconv_kernel, cin=Cin, cout_r=CoutR,
                             kh=kh, kw=kw, th=Th, wp=Wp)

    conv = pl.pallas_call(
        kern,
        out_shape=jax.ShapeDtypeStruct((B, CoutR, Hp, Wp), x_nchw.dtype),
        grid=(B, nH),
        in_specs=[
            pl.BlockSpec(memory_space=pltpu.MemorySpace.SMEM),      # weights
            pl.BlockSpec(memory_space=pltpu.MemorySpace.SMEM),      # bias
            pl.BlockSpec((None, Cin, Th + kh - 1, W),
                         lambda b, h: (b, 0, h, 0)),                # NCHW input
        ],
        out_specs=pl.BlockSpec((None, CoutR, Th, Wp),
                               lambda b, h: (b, 0, h, 0)),          # NCHW conv
        compiler_params=pltpu.CompilerParams(
            dimension_semantics=("parallel", "parallel")),
    )(wflat, bflat, x_nchw)

    # ---- sub-pixel shuffle (pure layout, matches the PyTorch view/permute) --
    # TODO(synk): fusing this W-interleave into the kernel needs a lane-strided
    # store / minor-dim lane reshape that Mosaic does not reliably support, so
    # it stays as a single XLA transpose pass over the (small) output.
    out = conv.reshape(B, r, Cout, Hp, Wp)         # channel o = ri*Cout + c
    out = jnp.transpose(out, (0, 2, 3, 4, 1))      # (B, Cout, Hp, Wp, r)
    return out.reshape(B, Cout, Hp, Wp * r)        # w_new = w*r + ri


def _reference(x_nchw, weight, bias, kernel_size, r):
    """Pure-JAX reference replicating the PyTorch forward."""
    B, Cin, H, W = x_nchw.shape
    CoutR = weight.shape[0]
    Cout = CoutR // r
    conv = jax.lax.conv_general_dilated(
        x_nchw, weight, window_strides=(1, 1), padding="VALID",
        dimension_numbers=("NCHW", "OIHW", "NCHW"))
    conv = conv + bias[None, :, None, None]
    _, _, Hp, Wp = conv.shape
    out = conv.reshape(B, r, Cout, Hp, Wp)
    out = jnp.transpose(out, (0, 2, 3, 4, 1))
    return out.reshape(B, Cout, Hp, Wp * r)


if __name__ == "__main__":
    # Module config (consistent with dbaiat usage: kernel (1,3), r=2)
    in_channels, out_channels, kernel_size, r = 4, 4, (1, 3), 2

    key = jax.random.PRNGKey(0)
    kx, kw_, kb = jax.random.split(key, 3)

    x = jax.random.normal(kx, (2, in_channels, 16, 16), dtype=jnp.float32)
    weight = 0.1 * jax.random.normal(
        kw_, (out_channels * r, in_channels, kernel_size[0], kernel_size[1]),
        dtype=jnp.float32)
    bias = 0.1 * jax.random.normal(kb, (out_channels * r,), dtype=jnp.float32)

    out = sp_conv_transpose2d(x, weight, bias, kernel_size, r)
    out = jax.block_until_ready(out)

    ref = _reference(x, weight, bias, kernel_size, r)
    assert out.shape == ref.shape, (out.shape, ref.shape)
    assert jnp.allclose(out, ref, atol=1e-4, rtol=1e-4), "mismatch vs reference"

    print("KERNEL_OK")
</pallas_src>

<mosaic_0001>
module attributes {stable_mosaic.version = 11 : i64} {
  func.func @_spconv_kernel(%arg0: i32, %arg1: i32, %arg2: memref<96xf32, #tpu.memory_space<smem>>, %arg3: memref<8xf32, #tpu.memory_space<smem>>, %arg4: memref<1x4x16x16xf32, #tpu.memory_space<vmem>>, %arg5: memref<1x8x16x14xf32, #tpu.memory_space<vmem>>) attributes {dimension_semantics = [#tpu.dimension_semantics<parallel>, #tpu.dimension_semantics<parallel>], iteration_bounds = array<i64: 2, 1>, scalar_prefetch = 0 : i64, scratch_operands = 0 : i64, tpu.core_type = #tpu.core_type<tc>, window_params = [{transform_indices = @transform_0, window_bounds = array<i64: 96>}, {transform_indices = @transform_1, window_bounds = array<i64: 8>}, {transform_indices = @transform_2, window_bounds = array<i64: 1, 4, 16, 16>}, {transform_indices = @transform_3, window_bounds = array<i64: 1, 8, 16, 14>}]} {
    %c0 = arith.constant 0 : index
    %c0_0 = arith.constant 0 : index
    %c0_1 = arith.constant 0 : index
    %c0_2 = arith.constant 0 : index
    %0 = vector.load %arg4[%c0, %c0_0, %c0_1, %c0_2] : memref<1x4x16x16xf32, #tpu.memory_space<vmem>>, vector<1x1x16x16xf32>
    %1 = vector.shape_cast %0 : vector<1x1x16x16xf32> to vector<16x16xf32>
    %2 = vector.extract_strided_slice %1 {offsets = [0, 0], sizes = [16, 14], strides = [1, 1]} : vector<16x16xf32> to vector<16x14xf32>
    %3 = vector.extract_strided_slice %1 {offsets = [0, 1], sizes = [16, 14], strides = [1, 1]} : vector<16x16xf32> to vector<16x14xf32>
    %4 = vector.extract_strided_slice %1 {offsets = [0, 2], sizes = [16, 14], strides = [1, 1]} : vector<16x16xf32> to vector<16x14xf32>
    %c0_3 = arith.constant 0 : index
    %c1 = arith.constant 1 : index
    %c0_4 = arith.constant 0 : index
    %c0_5 = arith.constant 0 : index
    %5 = vector.load %arg4[%c0_3, %c1, %c0_4, %c0_5] : memref<1x4x16x16xf32, #tpu.memory_space<vmem>>, vector<1x1x16x16xf32>
    %6 = vector.shape_cast %5 : vector<1x1x16x16xf32> to vector<16x16xf32>
    %7 = vector.extract_strided_slice %6 {offsets = [0, 0], sizes = [16, 14], strides = [1, 1]} : vector<16x16xf32> to vector<16x14xf32>
    %8 = vector.extract_strided_slice %6 {offsets = [0, 1], sizes = [16, 14], strides = [1, 1]} : vector<16x16xf32> to vector<16x14xf32>
    %9 = vector.extract_strided_slice %6 {offsets = [0, 2], sizes = [16, 14], strides = [1, 1]} : vector<16x16xf32> to vector<16x14xf32>
    %c0_6 = arith.constant 0 : index
    %c2 = arith.constant 2 : index
    %c0_7 = arith.constant 0 : index
    %c0_8 = arith.constant 0 : index
    %10 = vector.load %arg4[%c0_6, %c2, %c0_7, %c0_8] : memref<1x4x16x16xf32, #tpu.memory_space<vmem>>, vector<1x1x16x16xf32>
    %11 = vector.shape_cast %10 : vector<1x1x16x16xf32> to vector<16x16xf32>
    %12 = vector.extract_strided_slice %11 {offsets = [0, 0], sizes = [16, 14], strides = [1, 1]} : vector<16x16xf32> to vector<16x14xf32>
    %13 = vector.extract_strided_slice %11 {offsets = [0, 1], sizes = [16, 14], strides = [1, 1]} : vector<16x16xf32> to vector<16x14xf32>
    %14 = vector.extract_strided_slice %11 {offsets = [0, 2], sizes = [16, 14], strides = [1, 1]} : vector<16x16xf32> to vector<16x14xf32>
    %c0_9 = arith.constant 0 : index
    %c3 = arith.constant 3 : index
    %c0_10 = arith.constant 0 : index
    %c0_11 = arith.constant 0 : index
    %15 = vector.load %arg4[%c0_9, %c3, %c0_10, %c0_11] : memref<1x4x16x16xf32, #tpu.memory_space<vmem>>, vector<1x1x16x16xf32>
    %16 = vector.shape_cast %15 : vector<1x1x16x16xf32> to vector<16x16xf32>
    %17 = vector.extract_strided_slice %16 {offsets = [0, 0], sizes = [16, 14], strides = [1, 1]} : vector<16x16xf32> to vector<16x14xf32>
    %18 = vector.extract_strided_slice %16 {offsets = [0, 1], sizes = [16, 14], strides = [1, 1]} : vector<16x16xf32> to vector<16x14xf32>
    %19 = vector.extract_strided_slice %16 {offsets = [0, 2], sizes = [16, 14], strides = [1, 1]} : vector<16x16xf32> to vector<16x14xf32>
    %c0_12 = arith.constant 0 : index
    %20 = memref.load %arg3[%c0_12] : memref<8xf32, #tpu.memory_space<smem>>
    %21 = vector.broadcast %20 : f32 to vector<16x14xf32>
    %c0_13 = arith.constant 0 : index
    %22 = memref.load %arg2[%c0_13] : memref<96xf32, #tpu.memory_space<smem>>
    %23 = vector.broadcast %22 : f32 to vector<16x14xf32>
    %24 = arith.mulf %2, %23 : vector<16x14xf32>
    %25 = arith.addf %21, %24 : vector<16x14xf32>
    %c1_14 = arith.constant 1 : index
    %26 = memref.load %arg2[%c1_14] : memref<96xf32, #tpu.memory_space<smem>>
    %27 = vector.broadcast %26 : f32 to vector<16x14xf32>
    %28 = arith.mulf %3, %27 : vector<16x14xf32>
    %29 = arith.addf %25, %28 : vector<16x14xf32>
    %c2_15 = arith.constant 2 : index
    %30 = memref.load %arg2[%c2_15] : memref<96xf32, #tpu.memory_space<smem>>
    %31 = vector.broadcast %30 : f32 to vector<16x14xf32>
    %32 = arith.mulf %4, %31 : vector<16x14xf32>
    %33 = arith.addf %29, %32 : vector<16x14xf32>
    %c3_16 = arith.constant 3 : index
    %34 = memref.load %arg2[%c3_16] : memref<96xf32, #tpu.memory_space<smem>>
    %35 = vector.broadcast %34 : f32 to vector<16x14xf32>
    %36 = arith.mulf %7, %35 : vector<16x14xf32>
    %37 = arith.addf %33, %36 : vector<16x14xf32>
    %c4 = arith.constant 4 : index
    %38 = memref.load %arg2[%c4] : memref<96xf32, #tpu.memory_space<smem>>
    %39 = vector.broadcast %38 : f32 to vector<16x14xf32>
    %40 = arith.mulf %8, %39 : vector<16x14xf32>
    %41 = arith.addf %37, %40 : vector<16x14xf32>
    %c5 = arith.constant 5 : index
    %42 = memref.load %arg2[%c5] : memref<96xf32, #tpu.memory_space<smem>>
    %43 = vector.broadcast %42 : f32 to vector<16x14xf32>
    %44 = arith.mulf %9, %43 : vector<16x14xf32>
    %45 = arith.addf %41, %44 : vector<16x14xf32>
    %c6 = arith.constant 6 : index
    %46 = memref.load %arg2[%c6] : memref<96xf32, #tpu.memory_space<smem>>
    %47 = vector.broadcast %46 : f32 to vector<16x14xf32>
    %48 = arith.mulf %12, %47 : vector<16x14xf32>
    %49 = arith.addf %45, %48 : vector<16x14xf32>
    %c7 = arith.constant 7 : index
    %50 = memref.load %arg2[%c7] : memref<96xf32, #tpu.memory_space<smem>>
    %51 = vector.broadcast %50 : f32 to vector<16x14xf32>
    %52 = arith.mulf %13, %51 : vector<16x14xf32>
    %53 = arith.addf %49, %52 : vector<16x14xf32>
    %c8 = arith.constant 8 : index
    %54 = memref.load %arg2[%c8] : memref<96xf32, #tpu.memory_space<smem>>
    %55 = vector.broadcast %54 : f32 to vector<16x14xf32>
    %56 = arith.mulf %14, %55 : vector<16x14xf32>
    %57 = arith.addf %53, %56 : vector<16x14xf32>
    %c9 = arith.constant 9 : index
    %58 = memref.load %arg2[%c9] : memref<96xf32, #tpu.memory_space<smem>>
    %59 = vector.broadcast %58 : f32 to vector<16x14xf32>
    %60 = arith.mulf %17, %59 : vector<16x14xf32>
    %61 = arith.addf %57, %60 : vector<16x14xf32>
    %c10 = arith.constant 10 : index
    %62 = memref.load %arg2[%c10] : memref<96xf32, #tpu.memory_space<smem>>
    %63 = vector.broadcast %62 : f32 to vector<16x14xf32>
    %64 = arith.mulf %18, %63 : vector<16x14xf32>
    %65 = arith.addf %61, %64 : vector<16x14xf32>
    %c11 = arith.constant 11 : index
    %66 = memref.load %arg2[%c11] : memref<96xf32, #tpu.memory_space<smem>>
    %67 = vector.broadcast %66 : f32 to vector<16x14xf32>
    %68 = arith.mulf %19, %67 : vector<16x14xf32>
    %69 = arith.addf %65, %68 : vector<16x14xf32>
    %c0_17 = arith.constant 0 : index
    %c0_18 = arith.constant 0 : index
    %c0_19 = arith.constant 0 : index
    %c0_20 = arith.constant 0 : index
    %70 = vector.load %arg5[%c0_17, %c0_18, %c0_19, %c0_20] : memref<1x8x16x14xf32, #tpu.memory_space<vmem>>, vector<1x1x16x14xf32>
    %71 = vector.shape_cast %70 : vector<1x1x16x14xf32> to vector<16x14xf32>
    %72 = vector.shape_cast %69 : vector<16x14xf32> to vector<1x1x16x14xf32>
    tpu.vector_store %arg5[%c0_17, %c0_18, %c0_19, %c0_20], %72 {strides = array<i32>} : memref<1x8x16x14xf32, #tpu.memory_space<vmem>>, vector<1x1x16x14xf32>,
    %c1_21 = arith.constant 1 : index
    %73 = memref.load %arg3[%c1_21] : memref<8xf32, #tpu.memory_space<smem>>
    %74 = vector.broadcast %73 : f32 to vector<16x14xf32>
    %c12 = arith.constant 12 : index
    %75 = memref.load %arg2[%c12] : memref<96xf32, #tpu.memory_space<smem>>
    %76 = vector.broadcast %75 : f32 to vector<16x14xf32>
    %77 = arith.mulf %2, %76 : vector<16x14xf32>
    %78 = arith.addf %74, %77 : vector<16x14xf32>
    %c13 = arith.constant 13 : index
    %79 = memref.load %arg2[%c13] : memref<96xf32, #tpu.memory_space<smem>>
    %80 = vector.broadcast %79 : f32 to vector<16x14xf32>
    %81 = arith.mulf %3, %80 : vector<16x14xf32>
    %82 = arith.addf %78, %81 : vector<16x14xf32>
    %c14 = arith.constant 14 : index
    %83 = memref.load %arg2[%c14] : memref<96xf32, #tpu.memory_space<smem>>
    %84 = vector.broadcast %83 : f32 to vector<16x14xf32>
    %85 = arith.mulf %4, %84 : vector<16x14xf32>
    %86 = arith.addf %82, %85 : vector<16x14xf32>
    %c15 = arith.constant 15 : index
    %87 = memref.load %arg2[%c15] : memref<96xf32, #tpu.memory_space<smem>>
    %88 = vector.broadcast %87 : f32 to vector<16x14xf32>
    %89 = arith.mulf %7, %88 : vector<16x14xf32>
    %90 = arith.addf %86, %89 : vector<16x14xf32>
    %c16 = arith.constant 16 : index
    %91 = memref.load %arg2[%c16] : memref<96xf32, #tpu.memory_space<smem>>
    %92 = vector.broadcast %91 : f32 to vector<16x14xf32>
    %93 = arith.mulf %8, %92 : vector<16x14xf32>
    %94 = arith.addf %90, %93 : vector<16x14xf32>
    %c17 = arith.constant 17 : index
    %95 = memref.load %arg2[%c17] : memref<96xf32, #tpu.memory_space<smem>>
    %96 = vector.broadcast %95 : f32 to vector<16x14xf32>
    %97 = arith.mulf %9, %96 : vector<16x14xf32>
    %98 = arith.addf %94, %97 : vector<16x14xf32>
    %c18 = arith.constant 18 : index
    %99 = memref.load %arg2[%c18] : memref<96xf32, #tpu.memory_space<smem>>
    %100 = vector.broadcast %99 : f32 to vector<16x14xf32>
    %101 = arith.mulf %12, %100 : vector<16x14xf32>
    %102 = arith.addf %98, %101 : vector<16x14xf32>
    %c19 = arith.constant 19 : index
    %103 = memref.load %arg2[%c19] : memref<96xf32, #tpu.memory_space<smem>>
    %104 = vector.broadcast %103 : f32 to vector<16x14xf32>
    %105 = arith.mulf %13, %104 : vector<16x14xf32>
    %106 = arith.addf %102, %105 : vector<16x14xf32>
    %c20 = arith.constant 20 : index
    %107 = memref.load %arg2[%c20] : memref<96xf32, #tpu.memory_space<smem>>
    %108 = vector.broadcast %107 : f32 to vector<16x14xf32>
    %109 = arith.mulf %14, %108 : vector<16x14xf32>
    %110 = arith.addf %106, %109 : vector<16x14xf32>
    %c21 = arith.constant 21 : index
    %111 = memref.load %arg2[%c21] : memref<96xf32, #tpu.memory_space<smem>>
    %112 = vector.broadcast %111 : f32 to vector<16x14xf32>
    %113 = arith.mulf %17, %112 : vector<16x14xf32>
    %114 = arith.addf %110, %113 : vector<16x14xf32>
    %c22 = arith.constant 22 : index
    %115 = memref.load %arg2[%c22] : memref<96xf32, #tpu.memory_space<smem>>
    %116 = vector.broadcast %115 : f32 to vector<16x14xf32>
    %117 = arith.mulf %18, %116 : vector<16x14xf32>
    %118 = arith.addf %114, %117 : vector<16x14xf32>
    %c23 = arith.constant 23 : index
    %119 = memref.load %arg2[%c23] : memref<96xf32, #tpu.memory_space<smem>>
    %120 = vector.broadcast %119 : f32 to vector<16x14xf32>
    %121 = arith.mulf %19, %120 : vector<16x14xf32>
    %122 = arith.addf %118, %121 : vector<16x14xf32>
    %c0_22 = arith.constant 0 : index
    %c1_23 = arith.constant 1 : index
    %c0_24 = arith.constant 0 : index
    %c0_25 = arith.constant 0 : index
    %123 = vector.load %arg5[%c0_22, %c1_23, %c0_24, %c0_25] : memref<1x8x16x14xf32, #tpu.memory_space<vmem>>, vector<1x1x16x14xf32>
    %124 = vector.shape_cast %123 : vector<1x1x16x14xf32> to vector<16x14xf32>
    %125 = vector.shape_cast %122 : vector<16x14xf32> to vector<1x1x16x14xf32>
    tpu.vector_store %arg5[%c0_22, %c1_23, %c0_24, %c0_25], %125 {strides = array<i32>} : memref<1x8x16x14xf32, #tpu.memory_space<vmem>>, vector<1x1x16x14xf32>,
    %c2_26 = arith.constant 2 : index
    %126 = memref.load %arg3[%c2_26] : memref<8xf32, #tpu.memory_space<smem>>
    %127 = vector.broadcast %126 : f32 to vector<16x14xf32>
    %c24 = arith.constant 24 : index
    %128 = memref.load %arg2[%c24] : memref<96xf32, #tpu.memory_space<smem>>
    %129 = vector.broadcast %128 : f32 to vector<16x14xf32>
    %130 = arith.mulf %2, %129 : vector<16x14xf32>
    %131 = arith.addf %127, %130 : vector<16x14xf32>
    %c25 = arith.constant 25 : index
    %132 = memref.load %arg2[%c25] : memref<96xf32, #tpu.memory_space<smem>>
    %133 = vector.broadcast %132 : f32 to vector<16x14xf32>
    %134 = arith.mulf %3, %133 : vector<16x14xf32>
    %135 = arith.addf %131, %134 : vector<16x14xf32>
    %c26 = arith.constant 26 : index
    %136 = memref.load %arg2[%c26] : memref<96xf32, #tpu.memory_space<smem>>
    %137 = vector.broadcast %136 : f32 to vector<16x14xf32>
    %138 = arith.mulf %4, %137 : vector<16x14xf32>
    %139 = arith.addf %135, %138 : vector<16x14xf32>
    %c27 = arith.constant 27 : index
    %140 = memref.load %arg2[%c27] : memref<96xf32, #tpu.memory_space<smem>>
    %141 = vector.broadcast %140 : f32 to vector<16x14xf32>
    %142 = arith.mulf %7, %141 : vector<16x14xf32>
    %143 = arith.addf %139, %142 : vector<16x14xf32>
    %c28 = arith.constant 28 : index
    %144 = memref.load %arg2[%c28] : memref<96xf32, #tpu.memory_space<smem>>
    %145 = vector.broadcast %144 : f32 to vector<16x14xf32>
    %146 = arith.mulf %8, %145 : vector<16x14xf32>
    %147 = arith.addf %143, %146 : vector<16x14xf32>
    %c29 = arith.constant 29 : index
    %148 = memref.load %arg2[%c29] : memref<96xf32, #tpu.memory_space<smem>>
    %149 = vector.broadcast %148 : f32 to vector<16x14xf32>
    %150 = arith.mulf %9, %149 : vector<16x14xf32>
    %151 = arith.addf %147, %150 : vector<16x14xf32>
    %c30 = arith.constant 30 : index
    %152 = memref.load %arg2[%c30] : memref<96xf32, #tpu.memory_space<smem>>
    %153 = vector.broadcast %152 : f32 to vector<16x14xf32>
    %154 = arith.mulf %12, %153 : vector<16x14xf32>
    %155 = arith.addf %151, %154 : vector<16x14xf32>
    %c31 = arith.constant 31 : index
    %156 = memref.load %arg2[%c31] : memref<96xf32, #tpu.memory_space<smem>>
    %157 = vector.broadcast %156 : f32 to vector<16x14xf32>
    %158 = arith.mulf %13, %157 : vector<16x14xf32>
    %159 = arith.addf %155, %158 : vector<16x14xf32>
    %c32 = arith.constant 32 : index
    %160 = memref.load %arg2[%c32] : memref<96xf32, #tpu.memory_space<smem>>
    %161 = vector.broadcast %160 : f32 to vector<16x14xf32>
    %162 = arith.mulf %14, %161 : vector<16x14xf32>
    %163 = arith.addf %159, %162 : vector<16x14xf32>
    %c33 = arith.constant 33 : index
    %164 = memref.load %arg2[%c33] : memref<96xf32, #tpu.memory_space<smem>>
    %165 = vector.broadcast %164 : f32 to vector<16x14xf32>
    %166 = arith.mulf %17, %165 : vector<16x14xf32>
    %167 = arith.addf %163, %166 : vector<16x14xf32>
    %c34 = arith.constant 34 : index
    %168 = memref.load %arg2[%c34] : memref<96xf32, #tpu.memory_space<smem>>
    %169 = vector.broadcast %168 : f32 to vector<16x14xf32>
    %170 = arith.mulf %18, %169 : vector<16x14xf32>
    %171 = arith.addf %167, %170 : vector<16x14xf32>
    %c35 = arith.constant 35 : index
    %172 = memref.load %arg2[%c35] : memref<96xf32, #tpu.memory_space<smem>>
    %173 = vector.broadcast %172 : f32 to vector<16x14xf32>
    %174 = arith.mulf %19, %173 : vector<16x14xf32>
    %175 = arith.addf %171, %174 : vector<16x14xf32>
    %c0_27 = arith.constant 0 : index
    %c2_28 = arith.constant 2 : index
    %c0_29 = arith.constant 0 : index
    %c0_30 = arith.constant 0 : index
    %176 = vector.load %arg5[%c0_27, %c2_28, %c0_29, %c0_30] : memref<1x8x16x14xf32, #tpu.memory_space<vmem>>, vector<1x1x16x14xf32>
    %177 = vector.shape_cast %176 : vector<1x1x16x14xf32> to vector<16x14xf32>
    %178 = vector.shape_cast %175 : vector<16x14xf32> to vector<1x1x16x14xf32>
    tpu.vector_store %arg5[%c0_27, %c2_28, %c0_29, %c0_30], %178 {strides = array<i32>} : memref<1x8x16x14xf32, #tpu.memory_space<vmem>>, vector<1x1x16x14xf32>,
    %c3_31 = arith.constant 3 : index
    %179 = memref.load %arg3[%c3_31] : memref<8xf32, #tpu.memory_space<smem>>
    %180 = vector.broadcast %179 : f32 to vector<16x14xf32>
    %c36 = arith.constant 36 : index
    %181 = memref.load %arg2[%c36] : memref<96xf32, #tpu.memory_space<smem>>
    %182 = vector.broadcast %181 : f32 to vector<16x14xf32>
    %183 = arith.mulf %2, %182 : vector<16x14xf32>
    %184 = arith.addf %180, %183 : vector<16x14xf32>
    %c37 = arith.constant 37 : index
    %185 = memref.load %arg2[%c37] : memref<96xf32, #tpu.memory_space<smem>>
    %186 = vector.broadcast %185 : f32 to vector<16x14xf32>
    %187 = arith.mulf %3, %186 : vector<16x14xf32>
    %188 = arith.addf %184, %187 : vector<16x14xf32>
    %c38 = arith.constant 38 : index
    %189 = memref.load %arg2[%c38] : memref<96xf32, #tpu.memory_space<smem>>
    %190 = vector.broadcast %189 : f32 to vector<16x14xf32>
    %191 = arith.mulf %4, %190 : vector<16x14xf32>
    %192 = arith.addf %188, %191 : vector<16x14xf32>
    %c39 = arith.constant 39 : index
    %193 = memref.load %arg2[%c39] : memref<96xf32, #tpu.memory_space<smem>>
    %194 = vector.broadcast %193 : f32 to vector<16x14xf32>
    %195 = arith.mulf %7, %194 : vector<16x14xf32>
    %196 = arith.addf %192, %195 : vector<16x14xf32>
    %c40 = arith.constant 40 : index
    %197 = memref.load %arg2[%c40] : memref<96xf32, #tpu.memory_space<smem>>
    %198 = vector.broadcast %197 : f32 to vector<16x14xf32>
    %199 = arith.mulf %8, %198 : vector<16x14xf32>
    %200 = arith.addf %196, %199 : vector<16x14xf32>
    %c41 = arith.constant 41 : index
    %201 = memref.load %arg2[%c41] : memref<96xf32, #tpu.memory_space<smem>>
    %202 = vector.broadcast %201 : f32 to vector<16x14xf32>
    %203 = arith.mulf %9, %202 : vector<16x14xf32>
    %204 = arith.addf %200, %203 : vector<16x14xf32>
    %c42 = arith.constant 42 : index
    %205 = memref.load %arg2[%c42] : memref<96xf32, #tpu.memory_space<smem>>
    %206 = vector.broadcast %205 : f32 to vector<16x14xf32>
    %207 = arith.mulf %12, %206 : vector<16x14xf32>
    %208 = arith.addf %204, %207 : vector<16x14xf32>
    %c43 = arith.constant 43 : index
    %209 = memref.load %arg2[%c43] : memref<96xf32, #tpu.memory_space<smem>>
    %210 = vector.broadcast %209 : f32 to vector<16x14xf32>
    %211 = arith.mulf %13, %210 : vector<16x14xf32>
    %212 = arith.addf %208, %211 : vector<16x14xf32>
    %c44 = arith.constant 44 : index
    %213 = memref.load %arg2[%c44] : memref<96xf32, #tpu.memory_space<smem>>
    %214 = vector.broadcast %213 : f32 to vector<16x14xf32>
    %215 = arith.mulf %14, %214 : vector<16x14xf32>
    %216 = arith.addf %212, %215 : vector<16x14xf32>
    %c45 = arith.constant 45 : index
    %217 = memref.load %arg2[%c45] : memref<96xf32, #tpu.memory_space<smem>>
    %218 = vector.broadcast %217 : f32 to vector<16x14xf32>
    %219 = arith.mulf %17, %218 : vector<16x14xf32>
    %220 = arith.addf %216, %219 : vector<16x14xf32>
    %c46 = arith.constant 46 : index
    %221 = memref.load %arg2[%c46] : memref<96xf32, #tpu.memory_space<smem>>
    %222 = vector.broadcast %221 : f32 to vector<16x14xf32>
    %223 = arith.mulf %18, %222 : vector<16x14xf32>
    %224 = arith.addf %220, %223 : vector<16x14xf32>
    %c47 = arith.constant 47 : index
    %225 = memref.load %arg2[%c47] : memref<96xf32, #tpu.memory_space<smem>>
    %226 = vector.broadcast %225 : f32 to vector<16x14xf32>
    %227 = arith.mulf %19, %226 : vector<16x14xf32>
    %228 = arith.addf %224, %227 : vector<16x14xf32>
    %c0_32 = arith.constant 0 : index
    %c3_33 = arith.constant 3 : index
    %c0_34 = arith.constant 0 : index
    %c0_35 = arith.constant 0 : index
    %229 = vector.load %arg5[%c0_32, %c3_33, %c0_34, %c0_35] : memref<1x8x16x14xf32, #tpu.memory_space<vmem>>, vector<1x1x16x14xf32>
    %230 = vector.shape_cast %229 : vector<1x1x16x14xf32> to vector<16x14xf32>
    %231 = vector.shape_cast %228 : vector<16x14xf32> to vector<1x1x16x14xf32>
    tpu.vector_store %arg5[%c0_32, %c3_33, %c0_34, %c0_35], %231 {strides = array<i32>} : memref<1x8x16x14xf32, #tpu.memory_space<vmem>>, vector<1x1x16x14xf32>,
    %c4_36 = arith.constant 4 : index
    %232 = memref.load %arg3[%c4_36] : memref<8xf32, #tpu.memory_space<smem>>
    %233 = vector.broadcast %232 : f32 to vector<16x14xf32>
    %c48 = arith.constant 48 : index
    %234 = memref.load %arg2[%c48] : memref<96xf32, #tpu.memory_space<smem>>
    %235 = vector.broadcast %234 : f32 to vector<16x14xf32>
    %236 = arith.mulf %2, %235 : vector<16x14xf32>
    %237 = arith.addf %233, %236 : vector<16x14xf32>
    %c49 = arith.constant 49 : index
    %238 = memref.load %arg2[%c49] : memref<96xf32, #tpu.memory_space<smem>>
    %239 = vector.broadcast %238 : f32 to vector<16x14xf32>
    %240 = arith.mulf %3, %239 : vector<16x14xf32>
    %241 = arith.addf %237, %240 : vector<16x14xf32>
    %c50 = arith.constant 50 : index
    %242 = memref.load %arg2[%c50] : memref<96xf32, #tpu.memory_space<smem>>
    %243 = vector.broadcast %242 : f32 to vector<16x14xf32>
    %244 = arith.mulf %4, %243 : vector<16x14xf32>
    %245 = arith.addf %241, %244 : vector<16x14xf32>
    %c51 = arith.constant 51 : index
    %246 = memref.load %arg2[%c51] : memref<96xf32, #tpu.memory_space<smem>>
    %247 = vector.broadcast %246 : f32 to vector<16x14xf32>
    %248 = arith.mulf %7, %247 : vector<16x14xf32>
    %249 = arith.addf %245, %248 : vector<16x14xf32>
    %c52 = arith.constant 52 : index
    %250 = memref.load %arg2[%c52] : memref<96xf32, #tpu.memory_space<smem>>
    %251 = vector.broadcast %250 : f32 to vector<16x14xf32>
    %252 = arith.mulf %8, %251 : vector<16x14xf32>
    %253 = arith.addf %249, %252 : vector<16x14xf32>
    %c53 = arith.constant 53 : index
    %254 = memref.load %arg2[%c53] : memref<96xf32, #tpu.memory_space<smem>>
    %255 = vector.broadcast %254 : f32 to vector<16x14xf32>
    %256 = arith.mulf %9, %255 : vector<16x14xf32>
    %257 = arith.addf %253, %256 : vector<16x14xf32>
    %c54 = arith.constant 54 : index
    %258 = memref.load %arg2[%c54] : memref<96xf32, #tpu.memory_space<smem>>
    %259 = vector.broadcast %258 : f32 to vector<16x14xf32>
    %260 = arith.mulf %12, %259 : vector<16x14xf32>
    %261 = arith.addf %257, %260 : vector<16x14xf32>
    %c55 = arith.constant 55 : index
    %262 = memref.load %arg2[%c55] : memref<96xf32, #tpu.memory_space<smem>>
    %263 = vector.broadcast %262 : f32 to vector<16x14xf32>
    %264 = arith.mulf %13, %263 : vector<16x14xf32>
    %265 = arith.addf %261, %264 : vector<16x14xf32>
    %c56 = arith.constant 56 : index
    %266 = memref.load %arg2[%c56] : memref<96xf32, #tpu.memory_space<smem>>
    %267 = vector.broadcast %266 : f32 to vector<16x14xf32>
    %268 = arith.mulf %14, %267 : vector<16x14xf32>
    %269 = arith.addf %265, %268 : vector<16x14xf32>
    %c57 = arith.constant 57 : index
    %270 = memref.load %arg2[%c57] : memref<96xf32, #tpu.memory_space<smem>>
    %271 = vector.broadcast %270 : f32 to vector<16x14xf32>
    %272 = arith.mulf %17, %271 : vector<16x14xf32>
    %273 = arith.addf %269, %272 : vector<16x14xf32>
    %c58 = arith.constant 58 : index
    %274 = memref.load %arg2[%c58] : memref<96xf32, #tpu.memory_space<smem>>
    %275 = vector.broadcast %274 : f32 to vector<16x14xf32>
    %276 = arith.mulf %18, %275 : vector<16x14xf32>
    %277 = arith.addf %273, %276 : vector<16x14xf32>
    %c59 = arith.constant 59 : index
    %278 = memref.load %arg2[%c59] : memref<96xf32, #tpu.memory_space<smem>>
    %279 = vector.broadcast %278 : f32 to vector<16x14xf32>
    %280 = arith.mulf %19, %279 : vector<16x14xf32>
    %281 = arith.addf %277, %280 : vector<16x14xf32>
    %c0_37 = arith.constant 0 : index
    %c4_38 = arith.constant 4 : index
    %c0_39 = arith.constant 0 : index
    %c0_40 = arith.constant 0 : index
    %282 = vector.load %arg5[%c0_37, %c4_38, %c0_39, %c0_40] : memref<1x8x16x14xf32, #tpu.memory_space<vmem>>, vector<1x1x16x14xf32>
    %283 = vector.shape_cast %282 : vector<1x1x16x14xf32> to vector<16x14xf32>
    %284 = vector.shape_cast %281 : vector<16x14xf32> to vector<1x1x16x14xf32>
    tpu.vector_store %arg5[%c0_37, %c4_38, %c0_39, %c0_40], %284 {strides = array<i32>} : memref<1x8x16x14xf32, #tpu.memory_space<vmem>>, vector<1x1x16x14xf32>,
    %c5_41 = arith.constant 5 : index
    %285 = memref.load %arg3[%c5_41] : memref<8xf32, #tpu.memory_space<smem>>
    %286 = vector.broadcast %285 : f32 to vector<16x14xf32>
    %c60 = arith.constant 60 : index
    %287 = memref.load %arg2[%c60] : memref<96xf32, #tpu.memory_space<smem>>
    %288 = vector.broadcast %287 : f32 to vector<16x14xf32>
    %289 = arith.mulf %2, %288 : vector<16x14xf32>
    %290 = arith.addf %286, %289 : vector<16x14xf32>
    %c61 = arith.constant 61 : index
    %291 = memref.load %arg2[%c61] : memref<96xf32, #tpu.memory_space<smem>>
    %292 = vector.broadcast %291 : f32 to vector<16x14xf32>
    %293 = arith.mulf %3, %292 : vector<16x14xf32>
    %294 = arith.addf %290, %293 : vector<16x14xf32>
    %c62 = arith.constant 62 : index
    %295 = memref.load %arg2[%c62] : memref<96xf32, #tpu.memory_space<smem>>
    %296 = vector.broadcast %295 : f32 to vector<16x14xf32>
    %297 = arith.mulf %4, %296 : vector<16x14xf32>
    %298 = arith.addf %294, %297 : vector<16x14xf32>
    %c63 = arith.constant 63 : index
    %299 = memref.load %arg2[%c63] : memref<96xf32, #tpu.memory_space<smem>>
    %300 = vector.broadcast %299 : f32 to vector<16x14xf32>
    %301 = arith.mulf %7, %300 : vector<16x14xf32>
    %302 = arith.addf %298, %301 : vector<16x14xf32>
    %c64 = arith.constant 64 : index
    %303 = memref.load %arg2[%c64] : memref<96xf32, #tpu.memory_space<smem>>
    %304 = vector.broadcast %303 : f32 to vector<16x14xf32>
    %305 = arith.mulf %8, %304 : vector<16x14xf32>
    %306 = arith.addf %302, %305 : vector<16x14xf32>
    %c65 = arith.constant 65 : index
    %307 = memref.load %arg2[%c65] : memref<96xf32, #tpu.memory_space<smem>>
    %308 = vector.broadcast %307 : f32 to vector<16x14xf32>
    %309 = arith.mulf %9, %308 : vector<16x14xf32>
    %310 = arith.addf %306, %309 : vector<16x14xf32>
    %c66 = arith.constant 66 : index
    %311 = memref.load %arg2[%c66] : memref<96xf32, #tpu.memory_space<smem>>
    %312 = vector.broadcast %311 : f32 to vector<16x14xf32>
    %313 = arith.mulf %12, %312 : vector<16x14xf32>
    %314 = arith.addf %310, %313 : vector<16x14xf32>
    %c67 = arith.constant 67 : index
    %315 = memref.load %arg2[%c67] : memref<96xf32, #tpu.memory_space<smem>>
    %316 = vector.broadcast %315 : f32 to vector<16x14xf32>
    %317 = arith.mulf %13, %316 : vector<16x14xf32>
    %318 = arith.addf %314, %317 : vector<16x14xf32>
    %c68 = arith.constant 68 : index
    %319 = memref.load %arg2[%c68] : memref<96xf32, #tpu.memory_space<smem>>
    %320 = vector.broadcast %319 : f32 to vector<16x14xf32>
    %321 = arith.mulf %14, %320 : vector<16x14xf32>
    %322 = arith.addf %318, %321 : vector<16x14xf32>
    %c69 = arith.constant 69 : index
    %323 = memref.load %arg2[%c69] : memref<96xf32, #tpu.memory_space<smem>>
    %324 = vector.broadcast %323 : f32 to vector<16x14xf32>
    %325 = arith.mulf %17, %324 : vector<16x14xf32>
    %326 = arith.addf %322, %325 : vector<16x14xf32>
    %c70 = arith.constant 70 : index
    %327 = memref.load %arg2[%c70] : memref<96xf32, #tpu.memory_space<smem>>
    %328 = vector.broadcast %327 : f32 to vector<16x14xf32>
    %329 = arith.mulf %18, %328 : vector<16x14xf32>
    %330 = arith.addf %326, %329 : vector<16x14xf32>
    %c71 = arith.constant 71 : index
    %331 = memref.load %arg2[%c71] : memref<96xf32, #tpu.memory_space<smem>>
    %332 = vector.broadcast %331 : f32 to vector<16x14xf32>
    %333 = arith.mulf %19, %332 : vector<16x14xf32>
    %334 = arith.addf %330, %333 : vector<16x14xf32>
    %c0_42 = arith.constant 0 : index
    %c5_43 = arith.constant 5 : index
    %c0_44 = arith.constant 0 : index
    %c0_45 = arith.constant 0 : index
    %335 = vector.load %arg5[%c0_42, %c5_43, %c0_44, %c0_45] : memref<1x8x16x14xf32, #tpu.memory_space<vmem>>, vector<1x1x16x14xf32>
    %336 = vector.shape_cast %335 : vector<1x1x16x14xf32> to vector<16x14xf32>
    %337 = vector.shape_cast %334 : vector<16x14xf32> to vector<1x1x16x14xf32>
    tpu.vector_store %arg5[%c0_42, %c5_43, %c0_44, %c0_45], %337 {strides = array<i32>} : memref<1x8x16x14xf32, #tpu.memory_space<vmem>>, vector<1x1x16x14xf32>,
    %c6_46 = arith.constant 6 : index
    %338 = memref.load %arg3[%c6_46] : memref<8xf32, #tpu.memory_space<smem>>
    %339 = vector.broadcast %338 : f32 to vector<16x14xf32>
    %c72 = arith.constant 72 : index
    %340 = memref.load %arg2[%c72] : memref<96xf32, #tpu.memory_space<smem>>
    %341 = vector.broadcast %340 : f32 to vector<16x14xf32>
    %342 = arith.mulf %2, %341 : vector<16x14xf32>
    %343 = arith.addf %339, %342 : vector<16x14xf32>
    %c73 = arith.constant 73 : index
    %344 = memref.load %arg2[%c73] : memref<96xf32, #tpu.memory_space<smem>>
    %345 = vector.broadcast %344 : f32 to vector<16x14xf32>
    %346 = arith.mulf %3, %345 : vector<16x14xf32>
    %347 = arith.addf %343, %346 : vector<16x14xf32>
    %c74 = arith.constant 74 : index
    %348 = memref.load %arg2[%c74] : memref<96xf32, #tpu.memory_space<smem>>
    %349 = vector.broadcast %348 : f32 to vector<16x14xf32>
    %350 = arith.mulf %4, %349 : vector<16x14xf32>
    %351 = arith.addf %347, %350 : vector<16x14xf32>
    %c75 = arith.constant 75 : index
    %352 = memref.load %arg2[%c75] : memref<96xf32, #tpu.memory_space<smem>>
    %353 = vector.broadcast %352 : f32 to vector<16x14xf32>
    %354 = arith.mulf %7, %353 : vector<16x14xf32>
    %355 = arith.addf %351, %354 : vector<16x14xf32>
    %c76 = arith.constant 76 : index
    %356 = memref.load %arg2[%c76] : memref<96xf32, #tpu.memory_space<smem>>
    %357 = vector.broadcast %356 : f32 to vector<16x14xf32>
    %358 = arith.mulf %8, %357 : vector<16x14xf32>
    %359 = arith.addf %355, %358 : vector<16x14xf32>
    %c77 = arith.constant 77 : index
    %360 = memref.load %arg2[%c77] : memref<96xf32, #tpu.memory_space<smem>>
    %361 = vector.broadcast %360 : f32 to vector<16x14xf32>
    %362 = arith.mulf %9, %361 : vector<16x14xf32>
    %363 = arith.addf %359, %362 : vector<16x14xf32>
    %c78 = arith.constant 78 : index
    %364 = memref.load %arg2[%c78] : memref<96xf32, #tpu.memory_space<smem>>
    %365 = vector.broadcast %364 : f32 to vector<16x14xf32>
    %366 = arith.mulf %12, %365 : vector<16x14xf32>
    %367 = arith.addf %363, %366 : vector<16x14xf32>
    %c79 = arith.constant 79 : index
    %368 = memref.load %arg2[%c79] : memref<96xf32, #tpu.memory_space<smem>>
    %369 = vector.broadcast %368 : f32 to vector<16x14xf32>
    %370 = arith.mulf %13, %369 : vector<16x14xf32>
    %371 = arith.addf %367, %370 : vector<16x14xf32>
    %c80 = arith.constant 80 : index
    %372 = memref.load %arg2[%c80] : memref<96xf32, #tpu.memory_space<smem>>
    %373 = vector.broadcast %372 : f32 to vector<16x14xf32>
    %374 = arith.mulf %14, %373 : vector<16x14xf32>
    %375 = arith.addf %371, %374 : vector<16x14xf32>
    %c81 = arith.constant 81 : index
    %376 = memref.load %arg2[%c81] : memref<96xf32, #tpu.memory_space<smem>>
    %377 = vector.broadcast %376 : f32 to vector<16x14xf32>
    %378 = arith.mulf %17, %377 : vector<16x14xf32>
    %379 = arith.addf %375, %378 : vector<16x14xf32>
    %c82 = arith.constant 82 : index
    %380 = memref.load %arg2[%c82] : memref<96xf32, #tpu.memory_space<smem>>
    %381 = vector.broadcast %380 : f32 to vector<16x14xf32>
    %382 = arith.mulf %18, %381 : vector<16x14xf32>
    %383 = arith.addf %379, %382 : vector<16x14xf32>
    %c83 = arith.constant 83 : index
    %384 = memref.load %arg2[%c83] : memref<96xf32, #tpu.memory_space<smem>>
    %385 = vector.broadcast %384 : f32 to vector<16x14xf32>
    %386 = arith.mulf %19, %385 : vector<16x14xf32>
    %387 = arith.addf %383, %386 : vector<16x14xf32>
    %c0_47 = arith.constant 0 : index
    %c6_48 = arith.constant 6 : index
    %c0_49 = arith.constant 0 : index
    %c0_50 = arith.constant 0 : index
    %388 = vector.load %arg5[%c0_47, %c6_48, %c0_49, %c0_50] : memref<1x8x16x14xf32, #tpu.memory_space<vmem>>, vector<1x1x16x14xf32>
    %389 = vector.shape_cast %388 : vector<1x1x16x14xf32> to vector<16x14xf32>
    %390 = vector.shape_cast %387 : vector<16x14xf32> to vector<1x1x16x14xf32>
    tpu.vector_store %arg5[%c0_47, %c6_48, %c0_49, %c0_50], %390 {strides = array<i32>} : memref<1x8x16x14xf32, #tpu.memory_space<vmem>>, vector<1x1x16x14xf32>,
    %c7_51 = arith.constant 7 : index
    %391 = memref.load %arg3[%c7_51] : memref<8xf32, #tpu.memory_space<smem>>
    %392 = vector.broadcast %391 : f32 to vector<16x14xf32>
    %c84 = arith.constant 84 : index
    %393 = memref.load %arg2[%c84] : memref<96xf32, #tpu.memory_space<smem>>
    %394 = vector.broadcast %393 : f32 to vector<16x14xf32>
    %395 = arith.mulf %2, %394 : vector<16x14xf32>
    %396 = arith.addf %392, %395 : vector<16x14xf32>
    %c85 = arith.constant 85 : index
    %397 = memref.load %arg2[%c85] : memref<96xf32, #tpu.memory_space<smem>>
    %398 = vector.broadcast %397 : f32 to vector<16x14xf32>
    %399 = arith.mulf %3, %398 : vector<16x14xf32>
    %400 = arith.addf %396, %399 : vector<16x14xf32>
    %c86 = arith.constant 86 : index
    %401 = memref.load %arg2[%c86] : memref<96xf32, #tpu.memory_space<smem>>
    %402 = vector.broadcast %401 : f32 to vector<16x14xf32>
    %403 = arith.mulf %4, %402 : vector<16x14xf32>
    %404 = arith.addf %400, %403 : vector<16x14xf32>
    %c87 = arith.constant 87 : index
    %405 = memref.load %arg2[%c87] : memref<96xf32, #tpu.memory_space<smem>>
    %406 = vector.broadcast %405 : f32 to vector<16x14xf32>
    %407 = arith.mulf %7, %406 : vector<16x14xf32>
    %408 = arith.addf %404, %407 : vector<16x14xf32>
    %c88 = arith.constant 88 : index
    %409 = memref.load %arg2[%c88] : memref<96xf32, #tpu.memory_space<smem>>
    %410 = vector.broadcast %409 : f32 to vector<16x14xf32>
    %411 = arith.mulf %8, %410 : vector<16x14xf32>
    %412 = arith.addf %408, %411 : vector<16x14xf32>
    %c89 = arith.constant 89 : index
    %413 = memref.load %arg2[%c89] : memref<96xf32, #tpu.memory_space<smem>>
    %414 = vector.broadcast %413 : f32 to vector<16x14xf32>
    %415 = arith.mulf %9, %414 : vector<16x14xf32>
    %416 = arith.addf %412, %415 : vector<16x14xf32>
    %c90 = arith.constant 90 : index
    %417 = memref.load %arg2[%c90] : memref<96xf32, #tpu.memory_space<smem>>
    %418 = vector.broadcast %417 : f32 to vector<16x14xf32>
    %419 = arith.mulf %12, %418 : vector<16x14xf32>
    %420 = arith.addf %416, %419 : vector<16x14xf32>
    %c91 = arith.constant 91 : index
    %421 = memref.load %arg2[%c91] : memref<96xf32, #tpu.memory_space<smem>>
    %422 = vector.broadcast %421 : f32 to vector<16x14xf32>
    %423 = arith.mulf %13, %422 : vector<16x14xf32>
    %424 = arith.addf %420, %423 : vector<16x14xf32>
    %c92 = arith.constant 92 : index
    %425 = memref.load %arg2[%c92] : memref<96xf32, #tpu.memory_space<smem>>
    %426 = vector.broadcast %425 : f32 to vector<16x14xf32>
    %427 = arith.mulf %14, %426 : vector<16x14xf32>
    %428 = arith.addf %424, %427 : vector<16x14xf32>
    %c93 = arith.constant 93 : index
    %429 = memref.load %arg2[%c93] : memref<96xf32, #tpu.memory_space<smem>>
    %430 = vector.broadcast %429 : f32 to vector<16x14xf32>
    %431 = arith.mulf %17, %430 : vector<16x14xf32>
    %432 = arith.addf %428, %431 : vector<16x14xf32>
    %c94 = arith.constant 94 : index
    %433 = memref.load %arg2[%c94] : memref<96xf32, #tpu.memory_space<smem>>
    %434 = vector.broadcast %433 : f32 to vector<16x14xf32>
    %435 = arith.mulf %18, %434 : vector<16x14xf32>
    %436 = arith.addf %432, %435 : vector<16x14xf32>
    %c95 = arith.constant 95 : index
    %437 = memref.load %arg2[%c95] : memref<96xf32, #tpu.memory_space<smem>>
    %438 = vector.broadcast %437 : f32 to vector<16x14xf32>
    %439 = arith.mulf %19, %438 : vector<16x14xf32>
    %440 = arith.addf %436, %439 : vector<16x14xf32>
    %c0_52 = arith.constant 0 : index
    %c7_53 = arith.constant 7 : index
    %c0_54 = arith.constant 0 : index
    %c0_55 = arith.constant 0 : index
    %441 = vector.load %arg5[%c0_52, %c7_53, %c0_54, %c0_55] : memref<1x8x16x14xf32, #tpu.memory_space<vmem>>, vector<1x1x16x14xf32>
    %442 = vector.shape_cast %441 : vector<1x1x16x14xf32> to vector<16x14xf32>
    %443 = vector.shape_cast %440 : vector<16x14xf32> to vector<1x1x16x14xf32>
    tpu.vector_store %arg5[%c0_52, %c7_53, %c0_54, %c0_55], %443 {strides = array<i32>} : memref<1x8x16x14xf32, #tpu.memory_space<vmem>>, vector<1x1x16x14xf32>,
    return
  }
  func.func @transform_0(%arg0: i32, %arg1: i32) -> i32 {
    %c0_i32 = arith.constant 0 : i32
    %c0_i32_0 = arith.constant 0 : i32
    return %c0_i32 : i32
  }
  func.func @transform_1(%arg0: i32, %arg1: i32) -> i32 {
    %c0_i32 = arith.constant 0 : i32
    %c0_i32_0 = arith.constant 0 : i32
    return %c0_i32 : i32
  }
  func.func @transform_2(%arg0: i32, %arg1: i32) -> (i32, i32, i32, i32) {
    %c0_i32 = arith.constant 0 : i32
    %c0_i32_0 = arith.constant 0 : i32
    %c0_i32_1 = arith.constant 0 : i32
    return %arg0, %c0_i32, %arg1, %c0_i32_0 : i32, i32, i32, i32
  }
  func.func @transform_3(%arg0: i32, %arg1: i32) -> (i32, i32, i32, i32) {
    %c0_i32 = arith.constant 0 : i32
    %c0_i32_0 = arith.constant 0 : i32
    %c0_i32_1 = arith.constant 0 : i32
    return %arg0, %c0_i32, %arg1, %c0_i32_0 : i32, i32, i32, i32
  }
}

</mosaic_0001>

<bundles_post_ra>
// kernel: tpu_custom_call.1
= control target key start
LH: loop header
LB: loop body
LE: loop exit
PB: predicated region body
PF: predicated region fallthrough
CT: control target
= control target key end

     0   :  { %8 = vsyncpa [#allocation4], 0  ;;  %s2695_s0 = inlined_call_operand.hbm [shape: f32[96], index: 0, kind: input, shape index: {}]   ;;  %s2696_s1 = inlined_call_operand.vmem [shape: f32[8], index: 1, kind: input, shape index: {}]   ;;  %s2697_s2 = inlined_call_operand.hbm [shape: f32[2,4,16,16], index: 2, kind: input, shape index: {}]   ;;  %s2698_s3 = inlined_call_operand.vmem [shape: f32[2,8,16,14], index: 3, kind: output, shape index: {}]  }
   0x1   :  { %9 = vsyncpa [#allocation5], 0 }
   0x2   :  { %10 = vsyncpa [#allocation3], 0 }
   0x3   :  { %12 = vsyncpa [#allocation3 + $0x1], 0  ;;  %s1872_s12 = smov 0   ;;  %s1874_s13 = smov 0  }
   0x4   :  { %s1876_s14 = smov 0   ;;  %s1878_s15 = smov 0  }
   0x5   :  { %s1880_s16 = smov 0   ;;  %s1882_s17 = smov 0  }
   0x6 LB: > { %s1502_s18 = sadd.s32 4294967295, %s1843_s17   ;;  %s81_s19 = sadd.s32 1, %s1831_s14  ;;  %s1843_s17 = sphi %s1882_s17, %s18_s17   ;;  %s1839_s16 = sphi %s1880_s16, %s2708_s16   ;;  %s1835_s15 = sphi %s1878_s15, %s2707_s15   ;;  %s1831_s14 = sphi %s1876_s14, %s2706_s14   ;;  %s1827_s13 = sphi %s1874_s13, %s2705_s13   ;;  %s1823_s12 = sphi %s1872_s12, %s2704_s12  }
   0x7   : > { %p88_p0 = scmp.ne.s32.totalorder %s1831_s14, %s1827_s13  ;;  %p89_p1 = scmp.eq.s32.totalorder %s1843_s17, 0 }
   0x8   : > { %p94_p2 = scmp.ne.s32.totalorder %s1827_s13, %s1823_s12  ;;  %p1906_p3 = scmp.eq.s32.totalorder %s1502_s18, 0 }
   0x9   : > { %p90_p4 = por %p89_p1, %p88_p0  ;;  %p1504_p5 = scmp.ge.s32.totalorder %s1843_s17, 1 }
   0xa   : > { %p1913_p6 = por %p1906_p3, %p94_p2  ;;  %p133_p7 = scmp.lt.s32.totalorder %s1843_s17, 3 }
   0xb   : > { %p1666_p9 = scmp.lt.s32.totalorder %s1843_s17, 2  ;;  %s155_s25 = sshll.u32 %s2696_s1, 4  ;;  %s156_s25 = int_to_ptr.vmem [resolvable:$true] %s155_s25 }
   0xc   : > { %p1918_p8 = pnand %p1504_p5, %p133_p7  ;;  %s30_s28 = sadd.s32 1, %s1839_s16 }
   0xd   : > { %p1928_p11 = pnand %p1666_p9, %p90_p4  ;;  %s1845_s29 = smov [#allocation2]  }
   0xe   : > { %p1653_p10 = pneg %p1918_p8  ;;  %s1742_s5 = scalar_lea.vmem %s156_s25, 16 }
   0xf   : > { %p1743_p13 = scmp.ne.s32.totalorder %s156_s25, %s1742_s5  ;;  %p1750_p4 = scmp.lt.s32.totalorder %s156_s25, %s156_s25 }
  0x10   : > { %p1934_p12 = pnand %p1653_p10, %p1906_p3  ;;  %p1751_p5 = scmp.lt.s32.totalorder %s1742_s5, %s1742_s5 }
  0x12   : > { %1656 = dma.hbm_to_smem (!%p1934_p12), %s2695_s0, 16, %s1845_s29, [#allocation4]  }
  0x13   : > { %p1744_p0 = pneg %p1934_p12  ;;  %p1752_p7 = por %p1751_p5, %p1750_p4 }
  0x15   : > { %p1745_p1 = pnand %p1744_p0, %p1743_p13 }
  0x17   : > { %p1746_p2 = pneg %p1745_p1 }
  0x19   : > { %p1753_p9 = pnand %p1752_p7, %p1746_p2 }
  0x1b   : > { %1756 = shalt.err (!%p1753_p9)
}
  0x1c   : > { %s1846_s6 = smov [#allocation6]   ;;  %p32_p10 = scmp.ge.s32.totalorder %s30_s28, 2 }
  0x1d   : > { %1659 = dma.vmem_to_smem (!%p1934_p12), %s156_s25, 16, %s1846_s6, [#allocation5]  }
  0x1e   : > { %s166_s7 = sand.u32 1, %s1831_s14   ;;  %s2710_s28 = smov (%p32_p10, %s30_s28), 0 }
  0x1f   : > { %s1508_s8 = sshll.u32 %s166_s7, 6  ;;  %s1641_s9 = sshll.u32 %s1839_s16, 10 }
  0x20   : > { %s76_s10 = ssub.s32 %s1839_s16, %s2710_s28  ;;  %s178_s18 = scalar_lea.hbm %s2697_s2, %s1641_s9 }
  0x21   : > { %p79_p13 = scmp.eq.s32.totalorder %s76_s10, 0  ;;  %s170_s23 = scalar_lea.vmem [#allocation7], %s1508_s8 }
  0x22   : > { %s179_s24 = sshll.u32 %s170_s23, 4  ;;  %s167_s25 = scalar_lea.sflag [#allocation3], %s166_s7  ;;  %s180_s24 = int_to_ptr.vmem [resolvable:$true] %s179_s24 }
  0x23   : > { %s1960_s27 = scalar_select %p79_p13, %s1831_s14, %s81_s19  }
  0x24   : > { %p1759_p12 = pneg %p1928_p11  ;;  %s1770_s29 = scalar_lea.vmem %s180_s24, 1024 }
  0x25   : > { %p1771_p0 = scmp.ne.s32.totalorder %s180_s24, %s1770_s29  ;;  %s1847_s30 = smov [#allocation7]  }
  0x26   : > { %s1775_s4 = sshll.u32 %s1847_s30, 4  ;;  %s1776_s4 = int_to_ptr.vmem [resolvable:$false] %s1775_s4 }
  0x27   : > { %p1773_p1 = pnand %p1771_p0, %p1759_p12  ;;  %s1777_s5 = scalar_lea.vmem %s1776_s4, 2048 }
  0x28   : > { %p1778_p4 = scmp.lt.s32.totalorder %s180_s24, %s1776_s4  ;;  %p1779_p5 = scmp.lt.s32.totalorder %s1777_s5, %s1770_s29 }
  0x29   : > { %p1774_p2 = pneg %p1773_p1 }
  0x2a   : > { %p1780_p7 = por %p1779_p5, %p1778_p4 }
  0x2c   : > { %p1781_p9 = pnand %p1780_p7, %p1774_p2 }
  0x2e   : > { %1784 = shalt.err (!%p1781_p9)
}
  0x2f   : > { %s1848_s6 = smov 128   ;;  %s1849_s19 = smov 8  }
  0x30   : > { %1663 = dma.hbm_to_vmem [thread:$0]  (!%p1928_p11), %s178_s18, 1024, %s180_s24, %s167_s25, %s1848_s6, %s1848_s6, %s1849_s19  }
  0x31   : > { %191 = sbr.rel (%p1918_p8) target bundleno = 443 (0x1bb), region = 32 }
  0x36   : > { %1810 = dma.done.wait (%p1906_p3), [#allocation4], 16  }
  0x37   : > { %1812 = vsyncadd (%p1906_p3), [#allocation4], 4294967280 }
  0x38   : > { %1814 = dma.done.wait (%p1906_p3), [#allocation5], 16  }
  0x39   : > { %1816 = vsyncadd (%p1906_p3), [#allocation5], 4294967280  ;;  %s201_s7 = sand.u32 1, %s1827_s13  }
  0x3a   : > { %s1514_s26 = sshll.u32 %s201_s7, 6  ;;  %s202_s8 = scalar_lea.sflag [#allocation3], %s201_s7 }
  0x3b   : > { %s1977_s9 = scalar_lea.vmem [#allocation7], %s1514_s26 }
  0x3c   : > { %1818 = dma.done.wait (%p1913_p6), %s202_s8, 1024  }
  0x3d   : > { %1820 = vsyncadd (%p1913_p6), %s202_s8, 4294966272 }
  0x3e   : > { %210 = sfence }
  0x3f   : > { %s1524_s22 = sld [smem:[#allocation2 + $0x2]]  ;;  %v1984_v0 = vld [vmem:[%s1977_s9] sm:$0xff]  ;;  %v1987_v1 = vld [vmem:[%s1977_s9 + $0x8] sm:$0xff]  ;;  %s1850_s21 = smov 126   ;;  %v1996_v8 = vld [vmem:[%s1977_s9 + $0x18] sm:$0xff]  ;;  %vm393_vm0 = vcmask 113664  }
  0x40   : > { %s1523_s10 = sld [smem:[#allocation2 + $0x1]]  ;;  %s1851_s12 = smov 127   ;;  %v1999_v10 = vld [vmem:[%s1977_s9 + $0x10] sm:$0xff]  ;;  %v2010_v16 = vld [vmem:[%s1977_s9 + $0x28] sm:$0xff]  ;;  %v2013_v18 = vld [vmem:[%s1977_s9 + $0x20] sm:$0xff] }
  0x41   : > { %s1526_s20 = sld [smem:[#allocation2 + $0x4]]  ;;  %v2024_v24 = vld [vmem:[%s1977_s9 + $0x38] sm:$0xff]  ;;  %v2027_v26 = vld [vmem:[%s1977_s9 + $0x30] sm:$0xff]  ;;  %p235_p3 = scmp.lt.s32.totalorder %s1835_s15, 1 }
  0x42   : > { %s1527_s11 = sld [smem:[#allocation2 + $0x5]] }
  0x43   : > { %s1529_s18 = sld [smem:[#allocation2 + $0x7]]  ;;  %s2712_s15 = smov (!%p235_p3, %s1835_s15), 1 }
  0x44   : > { %s1530_s23 = sld [smem:[#allocation2 + $0x8]] }
  0x45   : > { %v278_v2 = vstv %s1524_s22  ;;  %s1532_s24 = sld [smem:[#allocation2 + $0xa]] }
  0x46   : > { %v279_v3 = vmul.f32 %v278_v2, %v1984_v0  ;;  %v264_v4 = vstv %s1523_s10  ;;  %v280_v6 = vmul.f32 %v278_v2, %v1987_v1  ;;  %s1533_s25 = sld [smem:[#allocation2 + $0xb]] }
  0x47   : > { %v265_v5 = vmul.f32 %v264_v4, %v1984_v0  ;;  %v266_v7 = vmul.f32 %v264_v4, %v1987_v1  ;;  %v298_v9 = vstv %s1526_s20  ;;  %s1536_s29 = sld [smem:[#allocation2 + $0xd]] }
  0x48   : > { %283 = vrot.lane.b32.xlu1 %v279_v3, %s1850_s21  ;;  %v300_v11 = vmul.f32 %v1996_v8, %v298_v9  ;;  %v299_v12 = vmul.f32 %v1999_v10, %v298_v9  ;;  %v312_v13 = vstv %s1527_s11  ;;  %s1537_s30 = sld [smem:[#allocation2 + $0xe]] }
  0x49   : > { %269 = vrot.lane.b32.xlu0 %v265_v5, %s1851_s12  ;;  %v314_v14 = vmul.f32 %v1996_v8, %v312_v13  ;;  %v313_v15 = vmul.f32 %v1999_v10, %v312_v13  ;;  %v332_v17 = vstv %s1529_s18  ;;  %s1539_s4 = sld [smem:[#allocation2 + $0x10]] }
  0x4a   : > { %v334_v19 = vmul.f32 %v2010_v16, %v332_v17  ;;  %v333_v20 = vmul.f32 %v2013_v18, %v332_v17  ;;  %v346_v21 = vstv %s1530_s23  ;;  %s1540_s5 = sld [smem:[#allocation2 + $0x11]] }
  0x4b   : > { %v348_v22 = vmul.f32 %v2010_v16, %v346_v21  ;;  %v347_v23 = vmul.f32 %v2013_v18, %v346_v21  ;;  %v366_v25 = vstv %s1532_s24  ;;  %s1542_s6 = sld [smem:[#allocation2 + $0x13]] }
  0x4c   : > { %285 = vrot.lane.b32.xlu1 %v280_v6, %s1850_s21  ;;  %v368_v27 = vmul.f32 %v2024_v24, %v366_v25  ;;  %v367_v28 = vmul.f32 %v2027_v26, %v366_v25  ;;  %v380_v29 = vstv %s1533_s25  ;;  %s1543_s19 = sld [smem:[#allocation2 + $0x14]] }
  0x4d   : > { %271 = vrot.lane.b32.xlu0 %v266_v7, %s1851_s12  ;;  %v382_v30 = vmul.f32 %v2024_v24, %v380_v29  ;;  %v381_v31 = vmul.f32 %v2027_v26, %v380_v29  ;;  %v405_v32 = vstv %s1536_s29  ;;  %s1545_s7 = sld [smem:[#allocation2 + $0x16]] }
  0x4e   : > { %v407_v33 = vmul.f32 %v405_v32, %v1987_v1  ;;  %v406_v34 = vmul.f32 %v405_v32, %v1984_v0  ;;  %v419_v35 = vstv %s1537_s30  ;;  %s1546_s26 = sld [smem:[#allocation2 + $0x17]] }
  0x4f   : > { %v421_v36 = vmul.f32 %v419_v35, %v1987_v1  ;;  %v420_v37 = vmul.f32 %v419_v35, %v1984_v0  ;;  %v439_v38 = vstv %s1539_s4  ;;  %s1551_s8 = sld [smem:[#allocation2 + $0x19]] }
  0x50   : > { %305 = vrot.lane.b32.xlu1 %v300_v11, %s1851_s12  ;;  %v441_v39 = vmul.f32 %v1996_v8, %v439_v38  ;;  %v440_v40 = vmul.f32 %v1999_v10, %v439_v38  ;;  %v453_v41 = vstv %s1540_s5  ;;  %s1552_s22 = sld [smem:[#allocation2 + $0x1a]] }
  0x51   : > { %303 = vrot.lane.b32.xlu0 %v299_v12, %s1851_s12  ;;  %v455_v42 = vmul.f32 %v1996_v8, %v453_v41  ;;  %v454_v43 = vmul.f32 %v1999_v10, %v453_v41  ;;  %v473_v44 = vstv %s1542_s6  ;;  %s1554_s10 = sld [smem:[#allocation2 + $0x1c]] }
  0x52   : > { %v475_v45 = vmul.f32 %v2010_v16, %v473_v44  ;;  %v474_v46 = vmul.f32 %v2013_v18, %v473_v44  ;;  %v487_v47 = vstv %s1543_s19  ;;  %s1555_s20 = sld [smem:[#allocation2 + $0x1d]] }
  0x53   : > { %v489_v48 = vmul.f32 %v2010_v16, %v487_v47  ;;  %v488_v49 = vmul.f32 %v2013_v18, %v487_v47  ;;  %v507_v50 = vstv %s1545_s7  ;;  %s1557_s11 = sld [smem:[#allocation2 + $0x1f]] }
  0x54   : > { %319 = vrot.lane.b32.xlu1 %v314_v14, %s1850_s21  ;;  %v509_v51 = vmul.f32 %v2024_v24, %v507_v50  ;;  %v508_v52 = vmul.f32 %v2027_v26, %v507_v50  ;;  %v521_v53 = vstv %s1546_s26  ;;  %s1558_s18 = sld [smem:[#allocation2 + $0x20]] }
  0x55   : > { %317 = vrot.lane.b32.xlu0 %v313_v15, %s1850_s21  ;;  %v523_v54 = vmul.f32 %v2024_v24, %v521_v53  ;;  %v522_v55 = vmul.f32 %v2027_v26, %v521_v53  ;;  %v546_v56 = vstv %s1551_s8  ;;  %s1560_s23 = sld [smem:[#allocation2 + $0x22]] }
  0x56   : > { %v548_v57 = vmul.f32 %v546_v56, %v1987_v1  ;;  %v547_v58 = vmul.f32 %v546_v56, %v1984_v0  ;;  %v560_v59 = vstv %s1552_s22  ;;  %s1561_s24 = sld [smem:[#allocation2 + $0x23]] }
  0x57   : > { %v562_v60 = vmul.f32 %v560_v59, %v1987_v1  ;;  %v561_v61 = vmul.f32 %v560_v59, %v1984_v0  ;;  %v580_v62 = vstv %s1554_s10  ;;  %s1566_s25 = sld [smem:[#allocation2 + $0x25]] }
  0x58   : > { %339 = vrot.lane.b32.xlu1 %v334_v19, %s1851_s12  ;;  %v582_v63 = vmul.f32 %v1996_v8, %v580_v62  ;;  %v581_v2 = vmul.f32 %v1999_v10, %v580_v62  ;;  %v594_v3 = vstv %s1555_s20  ;;  %s1567_s29 = sld [smem:[#allocation2 + $0x26]] }
  0x59   : > { %337 = vrot.lane.b32.xlu0 %v333_v20, %s1851_s12  ;;  %v596_v4 = vmul.f32 %v1996_v8, %v594_v3  ;;  %v595_v5 = vmul.f32 %v1999_v10, %v594_v3  ;;  %v614_v6 = vstv %s1557_s11  ;;  %s1569_s30 = sld [smem:[#allocation2 + $0x28]] }
  0x5a   : > { %v616_v7 = vmul.f32 %v2010_v16, %v614_v6  ;;  %v615_v9 = vmul.f32 %v2013_v18, %v614_v6  ;;  %v628_v11 = vstv %s1558_s18  ;;  %s1570_s4 = sld [smem:[#allocation2 + $0x29]] }
  0x5b   : > { %v630_v12 = vmul.f32 %v2010_v16, %v628_v11  ;;  %v629_v13 = vmul.f32 %v2013_v18, %v628_v11  ;;  %v648_v14 = vstv %s1560_s23  ;;  %s1572_s5 = sld [smem:[#allocation2 + $0x2b]] }
  0x5c   : > { %353 = vrot.lane.b32.xlu1 %v348_v22, %s1850_s21  ;;  %v650_v15 = vmul.f32 %v2024_v24, %v648_v14  ;;  %v649_v17 = vmul.f32 %v2027_v26, %v648_v14  ;;  %v662_v19 = vstv %s1561_s24  ;;  %s257_s6 = sld [smem:[#allocation2]] }
  0x5d   : > { %351 = vrot.lane.b32.xlu0 %v347_v23, %s1850_s21  ;;  %v664_v20 = vmul.f32 %v2024_v24, %v662_v19  ;;  %v663_v21 = vmul.f32 %v2027_v26, %v662_v19  ;;  %v687_v22 = vstv %s1566_s25  ;;  %s2111_s19 = sld [smem:[#allocation6]] }
  0x5e   : > { %v689_v23 = vmul.f32 %v687_v22, %v1987_v1  ;;  %v688_v25 = vmul.f32 %v687_v22, %v1984_v0  ;;  %s1573_s7 = sld [smem:[#allocation2 + $0x2c]] }
  0x5f   : > { %s1575_s26 = sld [smem:[#allocation2 + $0x2e]] }
  0x60   : > { %373 = vrot.lane.b32.xlu1 %v368_v27, %s1851_s12  ;;  %v701_v27 = vstv %s1567_s29  ;;  %s2122_s8 = sld [smem:[#allocation2 + $0x3]] }
  0x61   : > { %371 = vrot.lane.b32.xlu0 %v367_v28, %s1851_s12  ;;  %v703_v28 = vmul.f32 %v701_v27, %v1987_v1  ;;  %v702_v29 = vmul.f32 %v701_v27, %v1984_v0  ;;  %s2127_s22 = sld [smem:[#allocation2 + $0x2f]] }
  0x62   : > { %s2134_s10 = sld [smem:[#allocation2 + $0x31]] }
  0x63   : > { %v256_v41 = vstv %s2111_s19  ;;  %s2136_s20 = sld [smem:[#allocation2 + $0x6]]  ;;  %s1642_s19 = sshll.u32 %s2712_s15, 7 }
  0x64   : > { %387 = vrot.lane.b32.xlu1 %v382_v30, %s1850_s21  ;;  %v721_v30 = vstv %s1569_s30  ;;  %s2144_s11 = sld [smem:[#allocation2 + $0x32]] }
  0x65   : > { %385 = vrot.lane.b32.xlu0 %v381_v31, %s1850_s21  ;;  %v723_v31 = vmul.f32 %v1996_v8, %v721_v30  ;;  %v722_v32 = vmul.f32 %v1999_v10, %v721_v30  ;;  %v789_v47 = vstv %s1575_s26  ;;  %s2153_s18 = sld [smem:[#allocation2 + $0x34]] }
  0x66   : > { %v790_v53 = vmul.f32 %v2027_v26, %v789_v47  ;;  %s2155_s23 = sld [smem:[#allocation2 + $0x9]] }
  0x67   : > { %s2163_s24 = sld [smem:[#allocation2 + $0x35]] }
  0x68   : > { %412 = vrot.lane.b32.xlu1 %v407_v33, %s1851_s12  ;;  %v735_v33 = vstv %s1570_s4  ;;  %s2172_s25 = sld [smem:[#allocation2 + $0x37]] }
  0x69   : > { %410 = vrot.lane.b32.xlu0 %v406_v34, %s1851_s12  ;;  %v737_v34 = vmul.f32 %v1996_v8, %v735_v33  ;;  %v736_v35 = vmul.f32 %v1999_v10, %v735_v33  ;;  %v326_v6 = vstv %s2136_s20  ;;  %s2175_s29 = sld [smem:[#allocation2 + $0xc]] }
  0x6a   : > { %v328_v19 = vmul.f32 %v2010_v16, %v326_v6  ;;  %s2184_s30 = sld [smem:[#allocation2 + $0x38]] }
  0x6b   : > { %s2187_s4 = sld [smem:[#allocation6 + $0x1]] }
  0x6c   : > { %426 = vrot.lane.b32.xlu1 %v421_v36, %s1850_s21  ;;  %v755_v36 = vstv %s1572_s5  ;;  %s2197_s5 = sld [smem:[#allocation2 + $0x3a]] }
  0x6d   : > { %424 = vrot.lane.b32.xlu0 %v420_v37, %s1850_s21  ;;  %v258_v37 = vstv %s257_s6  ;;  %v757_v38 = vmul.f32 %v2010_v16, %v755_v36  ;;  %s2200_s6 = sld [smem:[#allocation2 + $0xf]] }
  0x6e   : > { %s2237_s20 = sld [smem:[#allocation2 + $0x3e]] }
  0x6f   : > { %s2320_s26 = sld [smem:[#allocation2 + $0x58]] }
  0x70   : > { %446 = vrot.lane.b32.xlu1 %v441_v39, %s1851_s12  ;;  %v259_v39 = vmul.f32 %v258_v37, %v1984_v0  ;;  %s2328_s15 = sld [smem:[#allocation2 + $0x4d]] }
  0x71   : > { %444 = vrot.lane.b32.xlu0 %v440_v40, %s1851_s12  ;;  %v756_v40 = vmul.f32 %v2013_v18, %v755_v36 }
  0x74   : > { %460 = vrot.lane.b32.xlu1 %v455_v42, %s1850_s21  ;;  %v769_v42 = vstv %s1573_s7  ;;  %s2208_s7 = sld [smem:[#allocation2 + $0x3b]] }
  0x75   : > { %458 = vrot.lane.b32.xlu0 %v454_v43, %s1850_s21  ;;  %v261_v43 = vadd.f32 %v259_v39, %v256_v41  ;;  %v771_v44 = vmul.f32 %v2010_v16, %v769_v42 }
  0x78   : > { %480 = vrot.lane.b32.xlu1 %v475_v45, %s1851_s12  ;;  %v260_v45 = vmul.f32 %v258_v37, %v1987_v1 }
  0x79   : > { %478 = vrot.lane.b32.xlu0 %v474_v46, %s1851_s12  ;;  %v770_v46 = vmul.f32 %v2013_v18, %v769_v42 }
  0x7c   : > { %494 = vrot.lane.b32.xlu1 %v489_v48, %s1850_s21 }
  0x7d   : > { %492 = vrot.lane.b32.xlu0 %v488_v49, %s1850_s21 }
  0x80   : > { %514 = vrot.lane.b32.xlu1 %v509_v51, %s1851_s12  ;;  %v262_v51 = vadd.f32 %v260_v45, %v256_v41 }
  0x81   : > { %512 = vrot.lane.b32.xlu0 %v508_v52, %s1851_s12  ;;  %v791_v52 = vmul.f32 %v2024_v24, %v789_v47 }
  0x84   : > { %528 = vrot.lane.b32.xlu1 %v523_v54, %s1850_s21  ;;  %v292_v54 = vstv %s2122_s8  ;;  %s2213_s8 = scalar_lea.vmem %s2698_s3, %s1642_s19  ;;  %s2307_s19 = sld [smem:[#allocation2 + $0x4c]] }
  0x85   : > { %526 = vrot.lane.b32.xlu0 %v522_v55, %s1850_s21  ;;  %v803_v55 = vstv %s2127_s22  ;;  %s2224_s22 = sld [smem:[#allocation2 + $0x3d]] }
  0x86   : > { %v805_v62 = vmul.f32 %v2024_v24, %v803_v55 }
  0x88   : > { %553 = vrot.lane.b32.xlu1 %v548_v57, %s1851_s12 }
  0x89   : > { %551 = vrot.lane.b32.xlu0 %v547_v58, %s1851_s12  ;;  %v294_v58 = vmul.f32 %v1996_v8, %v292_v54 }
  0x8c   : > { %567 = vrot.lane.b32.xlu1 %v562_v60, %s1850_s21 }
  0x8d   : > { %565 = vrot.lane.b32.xlu0 %v561_v61, %s1850_s21  ;;  %v293_v61 = vmul.f32 %v1999_v10, %v292_v54 }
  0x90   : > { %587 = vrot.lane.b32.xlu1 %v582_v63, %s1851_s12  ;;  %v804_v63 = vmul.f32 %v2027_v26, %v803_v55 }
  0x91   : > { %585 = vrot.lane.b32.xlu0 %v581_v2, %s1851_s12  ;;  %v828_v2 = vstv %s2134_s10  ;;  %s2229_s10 = sld [smem:[#allocation2 + $0x12]] }
  0x92   : > { %v830_v11 = vmul.f32 %v828_v2, %v1987_v1 }
  0x94   : > { %601 = vrot.lane.b32.xlu1 %v596_v4, %s1850_s21 }
  0x95   : > { %599 = vrot.lane.b32.xlu0 %v595_v5, %s1850_s21 }
  0x98   : > { %621 = vrot.lane.b32.xlu1 %v616_v7, %s1851_s12 }
  0x99   : > { %619 = vrot.lane.b32.xlu0 %v615_v9, %s1851_s12 }
  0x9c   : > { %635 = vrot.lane.b32.xlu1 %v630_v12, %s1850_s21  ;;  %v829_v12 = vmul.f32 %v828_v2, %v1984_v0 }
  0x9d   : > { %633 = vrot.lane.b32.xlu0 %v629_v13, %s1850_s21  ;;  %v842_v13 = vstv %s2144_s11  ;;  %s2245_s11 = sld [smem:[#allocation2 + $0x40]] }
  0x9e   : > { %v843_v27 = vmul.f32 %v842_v13, %v1984_v0 }
  0xa0   : > { %655 = vrot.lane.b32.xlu1 %v650_v15, %s1851_s12 }
  0xa1   : > { %653 = vrot.lane.b32.xlu0 %v649_v17, %s1851_s12 }
  0xa4   : > { %669 = vrot.lane.b32.xlu1 %v664_v20, %s1850_s21  ;;  %v327_v20 = vmul.f32 %v2013_v18, %v326_v6  ;;  %v930_v6 = vstv %s2197_s5  ;;  %s2288_s5 = sld [smem:[#allocation2 + $0x1b]] }
  0xa5   : > { %667 = vrot.lane.b32.xlu0 %v663_v21, %s1850_s21 }
  0xa8   : > { %694 = vrot.lane.b32.xlu1 %v689_v23, %s1851_s12 }
  0xa9   : > { %692 = vrot.lane.b32.xlu0 %v688_v25, %s1851_s12  ;;  %v844_v25 = vmul.f32 %v842_v13, %v1987_v1  ;;  %v932_v13 = vmul.f32 %v2024_v24, %v930_v6 }
  0xac   : > { %708 = vrot.lane.b32.xlu1 %v703_v28, %s1850_s21  ;;  %v862_v28 = vstv %s2153_s18  ;;  %s2248_s18 = sld [smem:[#allocation2 + $0x15]] }
  0xad   : > { %706 = vrot.lane.b32.xlu0 %v702_v29, %s1850_s21  ;;  %v863_v36 = vmul.f32 %v1999_v10, %v862_v28 }
  0xb0   : > { %728 = vrot.lane.b32.xlu1 %v723_v31, %s1851_s12 }
  0xb1   : > { %726 = vrot.lane.b32.xlu0 %v722_v32, %s1851_s12  ;;  %v360_v32 = vstv %s2155_s23  ;;  %s2256_s23 = sld [smem:[#allocation2 + $0x41]] }
  0xb2   : > { %v362_v37 = vmul.f32 %v2024_v24, %v360_v32  ;;  %v361_v41 = vmul.f32 %v2027_v26, %v360_v32 }
  0xb4   : > { %742 = vrot.lane.b32.xlu1 %v737_v34, %s1850_s21  ;;  %v864_v34 = vmul.f32 %v1996_v8, %v862_v28 }
  0xb5   : > { %740 = vrot.lane.b32.xlu0 %v736_v35, %s1850_s21 }
  0xb8   : > { %762 = vrot.lane.b32.xlu1 %v757_v38, %s1851_s12  ;;  %v876_v38 = vstv %s2163_s24  ;;  %s2264_s24 = sld [smem:[#allocation2 + $0x49]] }
  0xb9   : > { %760 = vrot.lane.b32.xlu0 %v756_v40, %s1851_s12  ;;  %v878_v45 = vmul.f32 %v1996_v8, %v876_v38  ;;  %v877_v47 = vmul.f32 %v1999_v10, %v876_v38 }
  0xba   : > { %v284_v48 = vpop.permute.xlu1 %283 }
  0xbb   : > { %v270_v49 = vpop.permute.xlu0 %269 }
  0xbc   : > { %v275_v50 = vadd.f32 %v270_v49, %v261_v43  ;;  %776 = vrot.lane.b32.xlu1 %v771_v44, %s1850_s21 }
  0xbd   : > { %774 = vrot.lane.b32.xlu0 %v770_v46, %s1850_s21 }
  0xbe   : > { %v286_v56 = vpop.permute.xlu1 %285  ;;  %v289_v59 = vadd.f32 %v284_v48, %v275_v50  ;;  %v896_v48 = vstv %s2172_s25  ;;  %s2267_s25 = sld [smem:[#allocation2 + $0x18]] }
  0xbf   : > { %v272_v57 = vpop.permute.xlu0 %271  ;;  %v897_v55 = vmul.f32 %v2013_v18, %v896_v48 }
  0xc0   : > { %v276_v60 = vadd.f32 %v272_v57, %v262_v51  ;;  %796 = vrot.lane.b32.xlu1 %v791_v52, %s1851_s12  ;;  %v295_v9 = vadd.f32 %v293_v61, %v289_v59  ;;  %v399_v51 = vstv %s2175_s29  ;;  %v910_v57 = vstv %s2184_s30  ;;  %s2275_s29 = sld [smem:[#allocation2 + $0x55]] }
  0xc1   : > { %794 = vrot.lane.b32.xlu0 %v790_v53, %s1851_s12  ;;  %v898_v53 = vmul.f32 %v2010_v16, %v896_v48  ;;  %v400_v61 = vmul.f32 %v399_v51, %v1984_v0  ;;  %s2278_s30 = sld [smem:[#allocation6 + $0x2]] }
  0xc2   : > { %v290_v3 = vadd.f32 %v286_v56, %v276_v60  ;;  %v306_v4 = vpop.permute.xlu1 %305  ;;  %v401_v56 = vmul.f32 %v399_v51, %v1987_v1  ;;  %v397_v60 = vstv %s2187_s4  ;;  %s2285_s4 = sld [smem:[#allocation2 + $0x4a]] }
  0xc3   : > { %v304_v5 = vpop.permute.xlu0 %303 }
  0xc4   : > { %v296_v7 = vadd.f32 %v294_v58, %v290_v3  ;;  %810 = vrot.lane.b32.xlu1 %v805_v62, %s1850_s21  ;;  %v309_v15 = vadd.f32 %v304_v5, %v295_v9  ;;  %v912_v3 = vmul.f32 %v2010_v16, %v910_v57  ;;  %v911_v5 = vmul.f32 %v2013_v18, %v910_v57 }
  0xc5   : > { %808 = vrot.lane.b32.xlu0 %v804_v63, %s1850_s21  ;;  %v402_v9 = vadd.f32 %v400_v61, %v397_v60 }
  0xc6   : > { %v310_v14 = vadd.f32 %v306_v4, %v296_v7  ;;  %v320_v17 = vpop.permute.xlu1 %319  ;;  %v403_v4 = vadd.f32 %v401_v56, %v397_v60 }
  0xc7   : > { %v318_v21 = vpop.permute.xlu0 %317 }
  0xc8   : > { %v324_v22 = vadd.f32 %v320_v17, %v310_v14  ;;  %v323_v23 = vadd.f32 %v318_v21, %v309_v15  ;;  %835 = vrot.lane.b32.xlu1 %v830_v11, %s1851_s12  ;;  %v433_v11 = vstv %s2200_s6  ;;  %v931_v15 = vmul.f32 %v2027_v26, %v930_v6  ;;  %s2296_s6 = sld [smem:[#allocation2 + $0x56]] }
  0xc9   : > { %833 = vrot.lane.b32.xlu0 %v829_v12, %s1851_s12  ;;  %v435_v17 = vmul.f32 %v1996_v8, %v433_v11 }
  0xca   : > { %v340_v29 = vpop.permute.xlu1 %339  ;;  %v330_v30 = vadd.f32 %v328_v19, %v324_v22  ;;  %v329_v31 = vadd.f32 %v327_v20, %v323_v23  ;;  %v944_v19 = vstv %s2208_s7  ;;  %v434_v22 = vmul.f32 %v1999_v10, %v433_v11  ;;  %s2312_s7 = sld [smem:[#allocation2 + $0x1e]] }
  0xcb   : > { %v338_v33 = vpop.permute.xlu0 %337  ;;  %v946_v28 = vmul.f32 %v2024_v24, %v944_v19 }
  0xcc   : > { %849 = vrot.lane.b32.xlu1 %v844_v25, %s1850_s21  ;;  %v344_v35 = vadd.f32 %v340_v29, %v330_v30  ;;  %v343_v39 = vadd.f32 %v338_v33, %v329_v31  ;;  %v945_v30 = vmul.f32 %v2027_v26, %v944_v19  ;;  %v969_v31 = vstv %s2224_s22  ;;  %s2331_s22 = sld [smem:[#allocation2 + $0x21]] }
  0xcd   : > { %847 = vrot.lane.b32.xlu0 %v843_v27, %s1850_s21  ;;  %v970_v38 = vmul.f32 %v969_v31, %v1984_v0 }
  0xce   : > { %v354_v40 = vpop.permute.xlu1 %353 }
  0xcf   : > { %v358_v42 = vadd.f32 %v354_v40, %v344_v35  ;;  %v352_v43 = vpop.permute.xlu0 %351  ;;  %v983_v40 = vstv %s2237_s20  ;;  %s2347_s20 = sld [smem:[#allocation2 + $0x43]] }
  0xd0   : > { %v357_v44 = vadd.f32 %v352_v43, %v343_v39  ;;  %869 = vrot.lane.b32.xlu1 %v864_v34, %s1851_s12  ;;  %v467_v34 = vstv %s2229_s10  ;;  %s2339_s10 = sld [smem:[#allocation2 + $0x59]] }
  0xd1   : > { %867 = vrot.lane.b32.xlu0 %v863_v36, %s1851_s12  ;;  %v364_v46 = vadd.f32 %v362_v37, %v358_v42  ;;  %v971_v36 = vmul.f32 %v969_v31, %v1987_v1  ;;  %v469_v39 = vmul.f32 %v2010_v16, %v467_v34  ;;  %v468_v43 = vmul.f32 %v2013_v18, %v467_v34 }
  0xd2   : > { %v374_v49 = vpop.permute.xlu1 %373  ;;  %v363_v50 = vadd.f32 %v361_v41, %v357_v44 }
  0xd3   : > { %v372_v52 = vpop.permute.xlu0 %371  ;;  %v378_v54 = vadd.f32 %v374_v49, %v364_v46  ;;  %v984_v49 = vmul.f32 %v983_v40, %v1984_v0 }
  0xd4   : > { %883 = vrot.lane.b32.xlu1 %v878_v45, %s1850_s21  ;;  %v377_v58 = vadd.f32 %v372_v52, %v363_v50  ;;  %v1003_v50 = vstv %s2245_s11  ;;  %s2350_s11 = sld [smem:[#allocation2 + $0x24]] }
  0xd5   : > { %881 = vrot.lane.b32.xlu0 %v877_v47, %s1850_s21  ;;  %v985_v47 = vmul.f32 %v983_v40, %v1987_v1  ;;  %v1004_v57 = vmul.f32 %v1999_v10, %v1003_v50 }
  0xd6   : > { %v388_v59 = vpop.permute.xlu1 %387 }
  0xd7   : > { %v392_v62 = vadd.f32 %v388_v59, %v378_v54  ;;  %v386_v63 = vpop.permute.xlu0 %385  ;;  %v1017_v59 = vstv %s2256_s23  ;;  %s2361_s23 = sld [smem:[#allocation6 + $0x3]] }
  0xd8   : > { %v391_v2 = vadd.f32 %v386_v63, %v377_v58  ;;  %903 = vrot.lane.b32.xlu1 %v898_v53, %s1851_s12  ;;  %v501_v53 = vstv %s2248_s18  ;;  %v1018_v6 = vmul.f32 %v1999_v10, %v1017_v59  ;;  %s2358_s18 = sld [smem:[#allocation2 + $0x4f]] }
  0xd9   : > { %395 = vst.msk [vmem:[%s2213_s8 + $0x8] sm:$0xff] %vm393_vm0, %v392_v62  ;;  %901 = vrot.lane.b32.xlu0 %v897_v55, %s1851_s12  ;;  %v1005_v55 = vmul.f32 %v1996_v8, %v1003_v50  ;;  %v503_v58 = vmul.f32 %v2024_v24, %v501_v53  ;;  %v502_v62 = vmul.f32 %v2027_v26, %v501_v53 }
  0xda   : > { %394 = vst.msk [vmem:[%s2213_s8] sm:$0xff] %vm393_vm0, %v391_v2  ;;  %v413_v7 = vpop.permute.xlu1 %412 }
  0xdb   : > { %v411_v12 = vpop.permute.xlu0 %410  ;;  %v417_v14 = vadd.f32 %v413_v7, %v403_v4  ;;  %v1019_v4 = vmul.f32 %v1996_v8, %v1017_v59  ;;  %v1110_v7 = vstv %s2264_s24  ;;  %s2368_s24 = sld [smem:[#allocation2 + $0x5b]] }
  0xdc   : > { %917 = vrot.lane.b32.xlu1 %v912_v3, %s1850_s21  ;;  %v416_v20 = vadd.f32 %v411_v12, %v402_v9  ;;  %v540_v12 = vstv %s2267_s25  ;;  %s2371_s25 = sld [smem:[#allocation2 + $0x27]] }
  0xdd   : > { %915 = vrot.lane.b32.xlu0 %v911_v5, %s1850_s21  ;;  %v542_v19 = vmul.f32 %v540_v12, %v1987_v1 }
  0xde   : > { %v427_v21 = vpop.permute.xlu1 %426 }
  0xdf   : > { %v431_v23 = vadd.f32 %v427_v21, %v417_v14  ;;  %v425_v25 = vpop.permute.xlu0 %424  ;;  %v1112_v14 = vmul.f32 %v1110_v7, %v1987_v1 }
  0xe0   : > { %v430_v27 = vadd.f32 %v425_v25, %v416_v20  ;;  %937 = vrot.lane.b32.xlu1 %v932_v13, %s1851_s12  ;;  %v1251_v20 = vstv %s2275_s29  ;;  %v541_v25 = vmul.f32 %v540_v12, %v1984_v0  ;;  %s2379_s29 = sld [smem:[#allocation2 + $0x44]] }
  0xe1   : > { %935 = vrot.lane.b32.xlu0 %v931_v15, %s1851_s12  ;;  %v437_v29 = vadd.f32 %v435_v17, %v431_v23  ;;  %v1111_v17 = vmul.f32 %v1110_v7, %v1984_v0  ;;  %v538_v23 = vstv %s2278_s30  ;;  %s2393_s30 = sld [smem:[#allocation2 + $0x50]] }
  0xe2   : > { %v447_v32 = vpop.permute.xlu1 %446  ;;  %v436_v33 = vadd.f32 %v434_v22, %v430_v27  ;;  %v544_v31 = vadd.f32 %v542_v19, %v538_v23 }
  0xe3   : > { %v445_v35 = vpop.permute.xlu0 %444  ;;  %v451_v37 = vadd.f32 %v447_v32, %v437_v29  ;;  %v1252_v32 = vmul.f32 %v1251_v20, %v1984_v0 }
  0xe4   : > { %951 = vrot.lane.b32.xlu1 %v946_v28, %s1850_s21  ;;  %v450_v41 = vadd.f32 %v445_v35, %v436_v33  ;;  %v1124_v33 = vstv %s2285_s4  ;;  %v543_v35 = vadd.f32 %v541_v25, %v538_v23  ;;  %s2398_s4 = sld [smem:[#allocation2 + $0x2a]] }
  0xe5   : > { %949 = vrot.lane.b32.xlu0 %v945_v30, %s1850_s21  ;;  %v1253_v30 = vmul.f32 %v1251_v20, %v1987_v1  ;;  %v1125_v40 = vmul.f32 %v1124_v33, %v1984_v0 }
  0xe6   : > { %v461_v42 = vpop.permute.xlu1 %460 }
  0xe7   : > { %v465_v44 = vadd.f32 %v461_v42, %v451_v37  ;;  %v459_v45 = vpop.permute.xlu0 %458  ;;  %v1265_v42 = vstv %s2296_s6  ;;  %s2426_s6 = sld [smem:[#allocation2 + $0x46]] }
  0xe8   : > { %v464_v46 = vadd.f32 %v459_v45, %v450_v41  ;;  %976 = vrot.lane.b32.xlu1 %v971_v36, %s1851_s12  ;;  %v574_v36 = vstv %s2288_s5  ;;  %s2409_s5 = sld [smem:[#allocation2 + $0x5c]] }
  0xe9   : > { %974 = vrot.lane.b32.xlu0 %v970_v38, %s1851_s12  ;;  %v471_v48 = vadd.f32 %v469_v39, %v465_v44  ;;  %v1126_v38 = vmul.f32 %v1124_v33, %v1987_v1  ;;  %v576_v41 = vmul.f32 %v1996_v8, %v574_v36  ;;  %v575_v45 = vmul.f32 %v1999_v10, %v574_v36 }
  0xea   : > { %v481_v51 = vpop.permute.xlu1 %480  ;;  %v470_v52 = vadd.f32 %v468_v43, %v464_v46 }
  0xeb   : > { %v479_v54 = vpop.permute.xlu0 %478  ;;  %v485_v56 = vadd.f32 %v481_v51, %v471_v48  ;;  %v1266_v51 = vmul.f32 %v1265_v42, %v1984_v0 }
  0xec   : > { %990 = vrot.lane.b32.xlu1 %v985_v47, %s1850_s21  ;;  %v484_v60 = vadd.f32 %v479_v54, %v470_v52  ;;  %v1144_v52 = vstv %s2307_s19  ;;  %s2429_s19 = sld [smem:[#allocation2 + $0x2d]] }
  0xed   : > { %988 = vrot.lane.b32.xlu0 %v984_v49, %s1850_s21  ;;  %v1267_v49 = vmul.f32 %v1265_v42, %v1987_v1  ;;  %v1145_v59 = vmul.f32 %v1999_v10, %v1144_v52  ;;  %v2383_v42 = vld [vmem:[%s1977_s9] sm:$0xff] }
  0xee   : > { %v495_v61 = vpop.permute.xlu1 %494 }
  0xef   : > { %v499_v63 = vadd.f32 %v495_v61, %v485_v56  ;;  %v493_v2 = vpop.permute.xlu0 %492 }
  0xf0   : > { %v498_v3 = vadd.f32 %v493_v2, %v484_v60  ;;  %1010 = vrot.lane.b32.xlu1 %v1005_v55, %s1851_s12  ;;  %v608_v55 = vstv %s2312_s7  ;;  %v1285_v60 = vstv %s2320_s26  ;;  %s2437_s7 = sld [smem:[#allocation2 + $0x52]] }
  0xf1   : > { %1008 = vrot.lane.b32.xlu0 %v1004_v57, %s1851_s12  ;;  %v505_v5 = vadd.f32 %v503_v58, %v499_v63  ;;  %v1146_v57 = vmul.f32 %v1996_v8, %v1144_v52  ;;  %v610_v0 = vmul.f32 %v2010_v16, %v608_v55  ;;  %v609_v63 = vmul.f32 %v2013_v18, %v608_v55  ;;  %s2445_s26 = sld [smem:[#allocation2 + $0x5e]] }
  0xf2   : > { %v515_v9 = vpop.permute.xlu1 %514  ;;  %v504_v11 = vadd.f32 %v502_v62, %v498_v3  ;;  %v1286_v7 = vmul.f32 %v1999_v10, %v1285_v60  ;;  %v715_v52 = vstv %s2371_s25  ;;  %s1598_s25 = sld [smem:[#allocation2 + $0x3f]] }
  0xf3   : > { %v513_v13 = vpop.permute.xlu0 %512  ;;  %v519_v15 = vadd.f32 %v515_v9, %v505_v5  ;;  %v1287_v5 = vmul.f32 %v1996_v8, %v1285_v60  ;;  %v1158_v9 = vstv %s2328_s15  ;;  %s2448_s15 = sld [smem:[#allocation2 + $0x30]] }
  0xf4   : > { %1024 = vrot.lane.b32.xlu1 %v1019_v4, %s1850_s21  ;;  %v518_v21 = vadd.f32 %v513_v13, %v504_v11  ;;  %v642_v13 = vstv %s2331_s22  ;;  %v1159_v19 = vmul.f32 %v1999_v10, %v1158_v9  ;;  %s2462_s22 = sld [smem:[#allocation2 + $0x47]] }
  0xf5   : > { %1022 = vrot.lane.b32.xlu0 %v1018_v6, %s1850_s21  ;;  %v644_v20 = vmul.f32 %v2024_v24, %v642_v13  ;;  %v643_v25 = vmul.f32 %v2027_v26, %v642_v13 }
  0xf6   : > { %v529_v22 = vpop.permute.xlu1 %528 }
  0xf7   : > { %v533_v27 = vadd.f32 %v529_v22, %v519_v15  ;;  %v527_v28 = vpop.permute.xlu0 %526  ;;  %v1160_v15 = vmul.f32 %v1996_v8, %v1158_v9 }
  0xf8   : > { %v532_v29 = vadd.f32 %v527_v28, %v518_v21  ;;  %1117 = vrot.lane.b32.xlu1 %v1112_v14, %s1851_s12  ;;  %v1299_v21 = vstv %s2339_s10  ;;  %s2465_s10 = sld [smem:[#allocation6 + $0x4]] }
  0xf9   : > { %1548 = vst.msk [vmem:[%s2213_s8 + $0x18] sm:$0xff] %vm393_vm0, %v533_v27  ;;  %1115 = vrot.lane.b32.xlu0 %v1111_v17, %s1851_s12 }
  0xfa   : > { %1547 = vst.msk [vmem:[%s2213_s8 + $0x10] sm:$0xff] %vm393_vm0, %v532_v29  ;;  %v554_v34 = vpop.permute.xlu1 %553 }
  0xfb   : > { %v552_v37 = vpop.permute.xlu0 %551  ;;  %v558_v39 = vadd.f32 %v554_v34, %v544_v31  ;;  %v1300_v31 = vmul.f32 %v1999_v10, %v1299_v21  ;;  %v681_v34 = vstv %s2350_s11  ;;  %s2475_s11 = sld [smem:[#allocation2 + $0x33]] }
  0xfc   : > { %1258 = vrot.lane.b32.xlu1 %v1253_v30, %s1851_s12  ;;  %v557_v43 = vadd.f32 %v552_v37, %v543_v35  ;;  %v1301_v30 = vmul.f32 %v1996_v8, %v1299_v21  ;;  %v683_v37 = vmul.f32 %v681_v34, %v1987_v1 }
  0xfd   : > { %1256 = vrot.lane.b32.xlu0 %v1252_v32, %s1851_s12  ;;  %v1037_v32 = vstv %s2347_s20  ;;  %s2472_s20 = sld [smem:[#allocation2 + $0x53]] }
  0xfe   : > { %v568_v44 = vpop.permute.xlu1 %567  ;;  %v1039_v8 = vmul.f32 %v2010_v16, %v1037_v32  ;;  %v1038_v10 = vmul.f32 %v2013_v18, %v1037_v32 }
  0xff   : > { %v572_v46 = vadd.f32 %v568_v44, %v558_v39  ;;  %v566_v47 = vpop.permute.xlu0 %565 }
 0x100   : > { %v571_v48 = vadd.f32 %v566_v47, %v557_v43  ;;  %1131 = vrot.lane.b32.xlu1 %v1126_v38, %s1850_s21  ;;  %v1178_v38 = vstv %s2358_s18  ;;  %v682_v43 = vmul.f32 %v2383_v42, %v681_v34  ;;  %s2486_s18 = sld [smem:[#allocation2 + $0x5f]] }
 0x101   : > { %1129 = vrot.lane.b32.xlu0 %v1125_v40, %s1850_s21  ;;  %v578_v50 = vadd.f32 %v576_v41, %v572_v46  ;;  %v679_v41 = vstv %s2361_s23  ;;  %v1180_v1 = vmul.f32 %v2010_v16, %v1178_v38  ;;  %s1594_s23 = sld [smem:[#allocation6 + $0x5]] }
 0x102   : > { %v588_v53 = vpop.permute.xlu1 %587  ;;  %v577_v54 = vadd.f32 %v575_v45, %v571_v48  ;;  %v685_v47 = vadd.f32 %v683_v37, %v679_v41  ;;  %v1179_v48 = vmul.f32 %v2013_v18, %v1178_v38 }
 0x103   : > { %v586_v56 = vpop.permute.xlu0 %585  ;;  %v592_v58 = vadd.f32 %v588_v53, %v578_v50 }
 0x104   : > { %1272 = vrot.lane.b32.xlu1 %v1267_v49, %s1850_s21  ;;  %v591_v61 = vadd.f32 %v586_v56, %v577_v54  ;;  %v1319_v49 = vstv %s2368_s24  ;;  %s1610_s24 = sld [smem:[#allocation2 + $0x48]] }
 0x105   : > { %1270 = vrot.lane.b32.xlu0 %v1266_v51, %s1850_s21  ;;  %v684_v51 = vadd.f32 %v682_v43, %v679_v41  ;;  %v1321_v54 = vmul.f32 %v2010_v16, %v1319_v49  ;;  %v1320_v56 = vmul.f32 %v2013_v18, %v1319_v49  ;;  %v2417_v18 = vld [vmem:[%s1977_s9 + $0x28] sm:$0xff]  ;;  %v1353_v49 = vstv %s2445_s26  ;;  %s2603_s26 = sld [smem:[#allocation2 + $0x5a]] }
 0x106   : > { %v602_v62 = vpop.permute.xlu1 %601 }
 0x107   : > { %v606_v2 = vadd.f32 %v602_v62, %v592_v58  ;;  %v600_v3 = vpop.permute.xlu0 %599 }
 0x108   : > { %v605_v4 = vadd.f32 %v600_v3, %v591_v61  ;;  %1151 = vrot.lane.b32.xlu1 %v1146_v57, %s1851_s12  ;;  %v2405_v57 = vld [vmem:[%s1977_s9 + $0x18] sm:$0xff]  ;;  %v2412_v61 = vld [vmem:[%s1977_s9 + $0x10] sm:$0xff] }
 0x109   : > { %1149 = vrot.lane.b32.xlu0 %v1145_v59, %s1851_s12  ;;  %v612_v6 = vadd.f32 %v610_v0, %v606_v2  ;;  %v717_v58 = vmul.f32 %v2405_v57, %v715_v52  ;;  %v1051_v59 = vstv %s2379_s29  ;;  %v716_v16 = vmul.f32 %v2412_v61, %v715_v52  ;;  %s2560_s29 = sld [smem:[#allocation6 + $0x6]] }
 0x10a   : > { %v622_v11 = vpop.permute.xlu1 %621  ;;  %v611_v12 = vadd.f32 %v609_v63, %v605_v4  ;;  %v1053_v3 = vmul.f32 %v2417_v18, %v1051_v59  ;;  %v822_v52 = vstv %s2448_s15  ;;  %s2612_s15 = sld [smem:[#allocation2 + $0x45]] }
 0x10b   : > { %v620_v14 = vpop.permute.xlu0 %619  ;;  %v626_v17 = vadd.f32 %v622_v11, %v612_v6 }
 0x10c   : > { %1292 = vrot.lane.b32.xlu1 %v1287_v5, %s1851_s12  ;;  %v625_v22 = vadd.f32 %v620_v14, %v611_v12  ;;  %v2422_v5 = vld [vmem:[%s1977_s9 + $0x20] sm:$0xff]  ;;  %v749_v12 = vstv %s2398_s4  ;;  %s2570_s4 = sld [smem:[#allocation6 + $0x7]] }
 0x10d   : > { %1290 = vrot.lane.b32.xlu0 %v1286_v7, %s1851_s12  ;;  %v1052_v6 = vmul.f32 %v2422_v5, %v1051_v59  ;;  %v1192_v7 = vstv %s2393_s30  ;;  %s2562_s30 = sld [smem:[#allocation2 + $0x54]] }
 0x10e   : > { %v636_v23 = vpop.permute.xlu1 %635  ;;  %v1194_v14 = vmul.f32 %v2417_v18, %v1192_v7 }
 0x10f   : > { %v640_v27 = vadd.f32 %v636_v23, %v626_v17  ;;  %v634_v28 = vpop.permute.xlu0 %633  ;;  %v1193_v17 = vmul.f32 %v2422_v5, %v1192_v7  ;;  %v750_v23 = vmul.f32 %v2422_v5, %v749_v12 }
 0x110   : > { %v639_v29 = vadd.f32 %v634_v28, %v625_v22  ;;  %1165 = vrot.lane.b32.xlu1 %v1160_v15, %s1850_s21 }
 0x111   : > { %1163 = vrot.lane.b32.xlu0 %v1159_v19, %s1850_s21  ;;  %v646_v24 = vadd.f32 %v644_v20, %v640_v27  ;;  %v751_v19 = vmul.f32 %v2417_v18, %v749_v12  ;;  %v1333_v20 = vstv %s2409_s5  ;;  %s2576_s5 = sld [smem:[#allocation2 + $0x4b]] }
 0x112   : > { %v656_v26 = vpop.permute.xlu1 %655  ;;  %v645_v33 = vadd.f32 %v643_v25, %v639_v29  ;;  %v1335_v29 = vmul.f32 %v2417_v18, %v1333_v20 }
 0x113   : > { %v654_v35 = vpop.permute.xlu0 %653  ;;  %v660_v36 = vadd.f32 %v656_v26, %v646_v24  ;;  %v1334_v24 = vmul.f32 %v2422_v5, %v1333_v20 }
 0x114   : > { %1306 = vrot.lane.b32.xlu1 %v1301_v30, %s1850_s21  ;;  %v659_v39 = vadd.f32 %v654_v35, %v645_v33  ;;  %v783_v33 = vstv %s2429_s19  ;;  %v2452_v35 = vld [vmem:[%s1977_s9 + $0x38] sm:$0xff]  ;;  %s2586_s19 = sld [smem:[#allocation2 + $0x57]] }
 0x115   : > { %1304 = vrot.lane.b32.xlu0 %v1300_v31, %s1850_s21  ;;  %v1071_v31 = vstv %s2426_s6  ;;  %v785_v38 = vmul.f32 %v2452_v35, %v783_v33  ;;  %s2582_s6 = sld [smem:[#allocation2 + $0x42]] }
 0x116   : > { %v670_v40 = vpop.permute.xlu1 %669 }
 0x117   : > { %v674_v44 = vadd.f32 %v670_v40, %v660_v36  ;;  %v668_v45 = vpop.permute.xlu0 %667 }
 0x118   : > { %v673_v46 = vadd.f32 %v668_v45, %v659_v39  ;;  %1044 = vrot.lane.b32.xlu1 %v1039_v8, %s1851_s12  ;;  %v1073_v8 = vmul.f32 %v2452_v35, %v1071_v31  ;;  %v1212_v39 = vstv %s2437_s7  ;;  %s2597_s7 = sld [smem:[#allocation2 + $0x4e]] }
 0x119   : > { %1563 = vst.msk [vmem:[%s2213_s8 + $0x28] sm:$0xff] %vm393_vm0, %v674_v44  ;;  %1042 = vrot.lane.b32.xlu0 %v1038_v10, %s1851_s12  ;;  %v2457_v10 = vld [vmem:[%s1977_s9 + $0x30] sm:$0xff] }
 0x11a   : > { %1562 = vst.msk [vmem:[%s2213_s8 + $0x20] sm:$0xff] %vm393_vm0, %v673_v46  ;;  %v695_v50 = vpop.permute.xlu1 %694  ;;  %v1072_v37 = vmul.f32 %v2457_v10, %v1071_v31  ;;  %v784_v43 = vmul.f32 %v2457_v10, %v783_v33 }
 0x11b   : > { %v693_v53 = vpop.permute.xlu0 %692  ;;  %v699_v55 = vadd.f32 %v695_v50, %v685_v47 }
 0x11c   : > { %1185 = vrot.lane.b32.xlu1 %v1180_v1, %s1851_s12  ;;  %v698_v0 = vadd.f32 %v693_v53, %v684_v51  ;;  %v1214_v1 = vmul.f32 %v2452_v35, %v1212_v39 }
 0x11d   : > { %1183 = vrot.lane.b32.xlu0 %v1179_v48, %s1851_s12  ;;  %v1213_v48 = vmul.f32 %v2457_v10, %v1212_v39 }
 0x11e   : > { %v709_v60 = vpop.permute.xlu1 %708 }
 0x11f   : > { %v713_v62 = vadd.f32 %v709_v60, %v699_v55  ;;  %v707_v63 = vpop.permute.xlu0 %706 }
 0x120   : > { %v712_v2 = vadd.f32 %v707_v63, %v698_v0  ;;  %1326 = vrot.lane.b32.xlu1 %v1321_v54, %s1851_s12  ;;  %v1355_v54 = vmul.f32 %v2452_v35, %v1353_v49  ;;  %v1085_v0 = vstv %s2462_s22  ;;  %v823_v63 = vmul.f32 %v2383_v42, %v822_v52  ;;  %s2626_s22 = sld [smem:[#allocation2 + $0x51]] }
 0x121   : > { %1324 = vrot.lane.b32.xlu0 %v1320_v56, %s1851_s12  ;;  %v719_v4 = vadd.f32 %v717_v58, %v713_v62  ;;  %v1354_v56 = vmul.f32 %v2457_v10, %v1353_v49  ;;  %v2482_v58 = vld [vmem:[%s1977_s9 + $0x8] sm:$0xff]  ;;  %v820_v62 = vstv %s2465_s10  ;;  %s2500_s9 = sld [smem:[#allocation2 + $0x36]] }
 0x122   : > { %v729_v9 = vpop.permute.xlu1 %728  ;;  %v718_v11 = vadd.f32 %v716_v16, %v712_v2  ;;  %v824_v59 = vmul.f32 %v2482_v58, %v822_v52  ;;  %s2639_s10 = sld [smem:[#allocation2 + $0x5d]] }
 0x123   : > { %v727_v13 = vpop.permute.xlu0 %726  ;;  %v733_v15 = vadd.f32 %v729_v9, %v719_v4  ;;  %v1086_v9 = vmul.f32 %v2457_v10, %v1085_v0 }
 0x124   : > { %1058 = vrot.lane.b32.xlu1 %v1053_v3, %s1850_s21  ;;  %v732_v21 = vadd.f32 %v727_v13, %v718_v11  ;;  %v826_v7 = vadd.f32 %v824_v59, %v820_v62  ;;  %v1226_v11 = vstv %s2472_s20  ;;  %v825_v13 = vadd.f32 %v823_v63, %v820_v62 }
 0x125   : > { %1056 = vrot.lane.b32.xlu0 %v1052_v6, %s1850_s21  ;;  %v1087_v6 = vmul.f32 %v2452_v35, %v1085_v0  ;;  %v1227_v20 = vmul.f32 %v2457_v10, %v1226_v11 }
 0x126   : > { %v743_v22 = vpop.permute.xlu1 %742 }
 0x127   : > { %v747_v25 = vadd.f32 %v743_v22, %v733_v15  ;;  %v741_v27 = vpop.permute.xlu0 %740  ;;  %v1367_v22 = vstv %s2486_s18 }
 0x128   : > { %v746_v28 = vadd.f32 %v741_v27, %v732_v21  ;;  %1199 = vrot.lane.b32.xlu1 %v1194_v14, %s1850_s21  ;;  %v856_v14 = vstv %s2475_s11 }
 0x129   : > { %1197 = vrot.lane.b32.xlu0 %v1193_v17, %s1850_s21  ;;  %v753_v30 = vadd.f32 %v751_v19, %v747_v25  ;;  %v1228_v17 = vmul.f32 %v2452_v35, %v1226_v11  ;;  %v858_v21 = vmul.f32 %v2405_v57, %v856_v14  ;;  %v857_v27 = vmul.f32 %v2412_v61, %v856_v14 }
 0x12a   : > { %v763_v32 = vpop.permute.xlu1 %762  ;;  %v752_v26 = vadd.f32 %v750_v23, %v746_v28 }
 0x12b   : > { %v761_v34 = vpop.permute.xlu0 %760  ;;  %v767_v36 = vadd.f32 %v763_v32, %v753_v30  ;;  %v1368_v32 = vmul.f32 %v2457_v10, %v1367_v22 }
 0x12c   : > { %1340 = vrot.lane.b32.xlu1 %v1335_v29, %s1850_s21  ;;  %v766_v40 = vadd.f32 %v761_v34, %v752_v26  ;;  %v890_v34 = vstv %s2500_s9 }
 0x12d   : > { %1338 = vrot.lane.b32.xlu0 %v1334_v24, %s1850_s21  ;;  %v1369_v24 = vmul.f32 %v2452_v35, %v1367_v22 }
 0x12e   : > { %v777_v41 = vpop.permute.xlu1 %776 }
 0x12f   : > { %v781_v44 = vadd.f32 %v777_v41, %v767_v36  ;;  %v775_v45 = vpop.permute.xlu0 %774 }
 0x130   : > { %v780_v46 = vadd.f32 %v775_v45, %v766_v40  ;;  %1078 = vrot.lane.b32.xlu1 %v1073_v8, %s1851_s12  ;;  %v891_v40 = vmul.f32 %v2422_v5, %v890_v34 }
 0x131   : > { %1076 = vrot.lane.b32.xlu0 %v1072_v37, %s1851_s12  ;;  %v787_v47 = vadd.f32 %v785_v38, %v781_v44  ;;  %v892_v37 = vmul.f32 %v2417_v18, %v890_v34 }
 0x132   : > { %v797_v50 = vpop.permute.xlu1 %796  ;;  %v786_v51 = vadd.f32 %v784_v43, %v780_v46 }
 0x133   : > { %v795_v53 = vpop.permute.xlu0 %794  ;;  %v801_v55 = vadd.f32 %v797_v50, %v787_v47 }
 0x134   : > { %1219 = vrot.lane.b32.xlu1 %v1214_v1, %s1851_s12  ;;  %v800_v60 = vadd.f32 %v795_v53, %v786_v51 }
 0x135   : > { %1217 = vrot.lane.b32.xlu0 %v1213_v48, %s1851_s12 }
 0x136   : > { %v811_v16 = vpop.permute.xlu1 %810 }
 0x137   : > { %v815_v2 = vadd.f32 %v811_v16, %v801_v55  ;;  %v809_v3 = vpop.permute.xlu0 %808 }
 0x138   : > { %v814_v4 = vadd.f32 %v809_v3, %v800_v60  ;;  %1360 = vrot.lane.b32.xlu1 %v1355_v54, %s1851_s12 }
 0x139   : > { %1578 = vst.msk [vmem:[%s2213_s8 + $0x38] sm:$0xff] %vm393_vm0, %v815_v2  ;;  %1358 = vrot.lane.b32.xlu0 %v1354_v56, %s1851_s12  ;;  %s1589_s12 = sld [smem:[#allocation2 + $0x39]] }
 0x13a   : > { %1577 = vst.msk [vmem:[%s2213_s8 + $0x30] sm:$0xff] %vm393_vm0, %v814_v4  ;;  %v836_v12 = vpop.permute.xlu1 %835 }
 0x13b   : > { %v834_v15 = vpop.permute.xlu0 %833  ;;  %v840_v19 = vadd.f32 %v836_v12, %v826_v7 }
 0x13c   : > { %1092 = vrot.lane.b32.xlu1 %v1087_v6, %s1850_s21  ;;  %v839_v23 = vadd.f32 %v834_v15, %v825_v13 }
 0x13d   : > { %1090 = vrot.lane.b32.xlu0 %v1086_v9, %s1850_s21 }
 0x13e   : > { %v850_v25 = vpop.permute.xlu1 %849 }
 0x13f   : > { %v854_v28 = vadd.f32 %v850_v25, %v840_v19  ;;  %v848_v29 = vpop.permute.xlu0 %847  ;;  %v924_v47 = vstv %s1589_s12 }
 0x140   : > { %v853_v30 = vadd.f32 %v848_v29, %v839_v23  ;;  %1233 = vrot.lane.b32.xlu1 %v1228_v17, %s1850_s21  ;;  %v926_v50 = vmul.f32 %v2452_v35, %v924_v47  ;;  %v925_v53 = vmul.f32 %v2457_v10, %v924_v47 }
 0x141   : > { %1231 = vrot.lane.b32.xlu0 %v1227_v20, %s1850_s21  ;;  %v860_v31 = vadd.f32 %v858_v21, %v854_v28 }
 0x142   : > { %v870_v26 = vpop.permute.xlu1 %869  ;;  %v859_v33 = vadd.f32 %v857_v27, %v853_v30 }
 0x143   : > { %v868_v8 = vpop.permute.xlu0 %867  ;;  %v874_v36 = vadd.f32 %v870_v26, %v860_v31 }
 0x144   : > { %1374 = vrot.lane.b32.xlu1 %v1369_v24, %s1850_s21  ;;  %v873_v38 = vadd.f32 %v868_v8, %v859_v33 }
 0x145   : > { %1372 = vrot.lane.b32.xlu0 %v1368_v32, %s1850_s21  ;;  %s1595_s21 = sld [smem:[#allocation2 + $0x3c]] }
 0x146   : > { %v884_v39 = vpop.permute.xlu1 %883 }
 0x147   : > { %v888_v41 = vadd.f32 %v884_v39, %v874_v36  ;;  %v882_v43 = vpop.permute.xlu0 %881  ;;  %v961_v39 = vstv %s1594_s23 }
 0x148   : > { %v887_v44 = vadd.f32 %v882_v43, %v873_v38 }
 0x149   : > { %v894_v45 = vadd.f32 %v892_v37, %v888_v41  ;;  %v1104_v41 = vstv %s1610_s24 }
 0x14a   : > { %v904_v46 = vpop.permute.xlu1 %903  ;;  %v893_v1 = vadd.f32 %v891_v40, %v887_v44  ;;  %v1106_v47 = vmul.f32 %v2482_v58, %v1104_v41 }
 0x14b   : > { %v902_v48 = vpop.permute.xlu0 %901  ;;  %v908_v49 = vadd.f32 %v904_v46, %v894_v45  ;;  %v963_v8 = vstv %s1595_s21 }
 0x14c   : > { %v907_v51 = vadd.f32 %v902_v48, %v893_v1  ;;  %v965_v37 = vmul.f32 %v2482_v58, %v963_v8  ;;  %v964_v40 = vmul.f32 %v2383_v42, %v963_v8  ;;  %v997_v1 = vstv %s1598_s25 }
 0x14d   : > { %v1102_v48 = vstv %s2560_s29 }
 0x14e   : > { %v918_v52 = vpop.permute.xlu1 %917  ;;  %v967_v44 = vadd.f32 %v965_v37, %v961_v39  ;;  %v966_v46 = vadd.f32 %v964_v40, %v961_v39 }
 0x14f   : > { %v922_v54 = vadd.f32 %v918_v52, %v908_v49  ;;  %v916_v55 = vpop.permute.xlu0 %915  ;;  %v1105_v49 = vmul.f32 %v2383_v42, %v1104_v41  ;;  %v1279_v41 = vstv %s2586_s19 }
 0x150   : > { %v921_v56 = vadd.f32 %v916_v55, %v907_v51  ;;  %v999_v55 = vmul.f32 %v2405_v57, %v997_v1 }
 0x151   : > { %v928_v59 = vadd.f32 %v926_v50, %v922_v54  ;;  %v1245_v50 = vstv %s2562_s30 }
 0x152   : > { %v938_v0 = vpop.permute.xlu1 %937  ;;  %v927_v60 = vadd.f32 %v925_v53, %v921_v56 }
 0x153   : > { %v936_v16 = vpop.permute.xlu0 %935  ;;  %v942_v62 = vadd.f32 %v938_v0, %v928_v59  ;;  %v998_v59 = vmul.f32 %v2412_v61, %v997_v1  ;;  %v1108_v0 = vadd.f32 %v1106_v47, %v1102_v48 }
 0x154   : > { %v941_v63 = vadd.f32 %v936_v16, %v927_v60  ;;  %v1247_v60 = vmul.f32 %v2482_v58, %v1245_v50  ;;  %v1031_v58 = vstv %s2582_s6 }
 0x155   : > { %v1033_v47 = vmul.f32 %v2417_v18, %v1031_v58 }
 0x156   : > { %v952_v2 = vpop.permute.xlu1 %951 }
 0x157   : > { %v956_v3 = vadd.f32 %v952_v2, %v942_v62  ;;  %v950_v4 = vpop.permute.xlu0 %949  ;;  %v1107_v62 = vadd.f32 %v1105_v49, %v1102_v48  ;;  %v1246_v2 = vmul.f32 %v2383_v42, %v1245_v50  ;;  %v1281_v49 = vmul.f32 %v2405_v57, %v1279_v41 }
 0x158   : > { %v955_v6 = vadd.f32 %v950_v4, %v941_v63  ;;  %v1243_v63 = vstv %s2570_s4  ;;  %v1032_v50 = vmul.f32 %v2422_v5, %v1031_v58 }
 0x159   : > { %1593 = vst.msk [vmem:[%s2213_s8 + $0x48] sm:$0xff] %vm393_vm0, %v956_v3  ;;  %v1248_v39 = vadd.f32 %v1246_v2, %v1243_v63  ;;  %v1065_v2 = vstv %s2612_s15 }
 0x15a   : > { %1592 = vst.msk [vmem:[%s2213_s8 + $0x40] sm:$0xff] %vm393_vm0, %v955_v6  ;;  %v977_v7 = vpop.permute.xlu1 %976  ;;  %v1138_v6 = vstv %s2576_s5 }
 0x15b   : > { %v975_v9 = vpop.permute.xlu0 %974  ;;  %v981_v52 = vadd.f32 %v977_v7, %v967_v44  ;;  %v1140_v40 = vmul.f32 %v2405_v57, %v1138_v6  ;;  %v1280_v57 = vmul.f32 %v2412_v61, %v1279_v41 }
 0x15c   : > { %v980_v54 = vadd.f32 %v975_v9, %v966_v46 }
 0x15e   : > { %v991_v11 = vpop.permute.xlu1 %990 }
 0x15f   : > { %v989_v12 = vpop.permute.xlu0 %988  ;;  %v995_v56 = vadd.f32 %v991_v11, %v981_v52  ;;  %v1249_v11 = vadd.f32 %v1247_v60, %v1243_v63 }
 0x160   : > { %v994_v16 = vadd.f32 %v989_v12, %v980_v54 }
 0x161   : > { %v1001_v7 = vadd.f32 %v999_v55, %v995_v56 }
 0x162   : > { %v2524_v13 = vpop.permute.xlu1 %1010  ;;  %v1000_v8 = vadd.f32 %v998_v59, %v994_v16 }
 0x163   : > { %v2526_v14 = vpop.permute.xlu0 %1008  ;;  %v1015_v46 = vadd.f32 %v2524_v13, %v1001_v7  ;;  %v1172_v13 = vstv %s2597_s7 }
 0x166   : > { %v2528_v15 = vpop.permute.xlu1 %1024 }
 0x167   : > { %v2530_v17 = vpop.permute.xlu0 %1022 }
 0x16a   : > { %v1118_v19 = vpop.permute.xlu1 %1117 }
 0x16b   : > { %v1116_v20 = vpop.permute.xlu0 %1115  ;;  %v1122_v9 = vadd.f32 %v1118_v19, %v1108_v0 }
 0x16c   : > { %v1121_v37 = vadd.f32 %v1116_v20, %v1107_v62  ;;  %v1139_v20 = vmul.f32 %v2412_v61, %v1138_v6  ;;  %v1173_v61 = vmul.f32 %v2422_v5, %v1172_v13 }
 0x16e   : > { %v2532_v21 = vpop.permute.xlu1 %1258 }
 0x16f   : > { %v2534_v22 = vpop.permute.xlu0 %1256  ;;  %v1263_v1 = vadd.f32 %v2532_v21, %v1249_v11 }
 0x170   : > { %v1262_v48 = vadd.f32 %v2534_v22, %v1248_v39 }
 0x172   : > { %v2536_v23 = vpop.permute.xlu1 %1131 }
 0x173   : > { %v2538_v25 = vpop.permute.xlu0 %1129  ;;  %v1136_v42 = vadd.f32 %v2536_v23, %v1122_v9  ;;  %v1014_v23 = vadd.f32 %v2526_v14, %v1000_v8 }
 0x174   : > { %v1135_v19 = vadd.f32 %v2538_v25, %v1121_v37  ;;  %v1029_v25 = vadd.f32 %v2528_v15, %v1015_v46  ;;  %v1174_v15 = vmul.f32 %v2417_v18, %v1172_v13  ;;  %v1067_v37 = vmul.f32 %v2452_v35, %v1065_v2 }
 0x175   : > { %v1142_v55 = vadd.f32 %v1140_v40, %v1136_v42  ;;  %v1028_v14 = vadd.f32 %v2530_v17, %v1014_v23  ;;  %v1206_v40 = vstv %s2626_s22 }
 0x176   : > { %v2540_v27 = vpop.permute.xlu1 %1272  ;;  %v1141_v56 = vadd.f32 %v1139_v20, %v1135_v19  ;;  %v1035_v63 = vadd.f32 %v1033_v47, %v1029_v25  ;;  %v1208_v19 = vmul.f32 %v2452_v35, %v1206_v40 }
 0x177   : > { %v2542_v28 = vpop.permute.xlu0 %1270  ;;  %v1277_v54 = vadd.f32 %v2540_v27, %v1263_v1  ;;  %v1313_v27 = vstv %s2603_s26  ;;  %v1034_v7 = vadd.f32 %v1032_v50, %v1028_v14  ;;  %v1207_v1 = vmul.f32 %v2457_v10, %v1206_v40 }
 0x178   : > { %v1276_v22 = vadd.f32 %v2542_v28, %v1262_v48  ;;  %v1315_v9 = vmul.f32 %v2417_v18, %v1313_v27  ;;  %v1314_v8 = vmul.f32 %v2422_v5, %v1313_v27  ;;  %v1347_v48 = vstv %s2639_s10 }
 0x179   : > { %v1283_v16 = vadd.f32 %v1281_v49, %v1277_v54 }
 0x17a   : > { %v2544_v29 = vpop.permute.xlu1 %1151  ;;  %v1282_v17 = vadd.f32 %v1280_v57, %v1276_v22 }
 0x17b   : > { %v2546_v30 = vpop.permute.xlu0 %1149  ;;  %v1156_v59 = vadd.f32 %v2544_v29, %v1142_v55  ;;  %v1349_v55 = vmul.f32 %v2452_v35, %v1347_v48 }
 0x17c   : > { %v1155_v0 = vadd.f32 %v2546_v30, %v1141_v56  ;;  %v1348_v56 = vmul.f32 %v2457_v10, %v1347_v48 }
 0x17e   : > { %v2548_v24 = vpop.permute.xlu1 %1292 }
 0x17f   : > { %v2550_v31 = vpop.permute.xlu0 %1290  ;;  %v1297_v29 = vadd.f32 %v2548_v24, %v1283_v16 }
 0x182   : > { %v2552_v32 = vpop.permute.xlu1 %1165 }
 0x183   : > { %v2554_v26 = vpop.permute.xlu0 %1163  ;;  %v1170_v62 = vadd.f32 %v2552_v32, %v1156_v59  ;;  %v1296_v32 = vadd.f32 %v2550_v31, %v1282_v17 }
 0x184   : > { %v1169_v28 = vadd.f32 %v2554_v26, %v1155_v0 }
 0x185   : > { %v1176_v58 = vadd.f32 %v1174_v15, %v1170_v62 }
 0x186   : > { %v2556_v33 = vpop.permute.xlu1 %1306  ;;  %v1175_v18 = vadd.f32 %v1173_v61, %v1169_v28 }
 0x187   : > { %v2558_v34 = vpop.permute.xlu0 %1304  ;;  %v1311_v39 = vadd.f32 %v2556_v33, %v1297_v29 }
 0x189   : > { %v1317_v20 = vadd.f32 %v1315_v9, %v1311_v39 }
 0x18a   : > { %v2564_v36 = vpop.permute.xlu1 %1044 }
 0x18b   : > { %v2567_v38 = vpop.permute.xlu0 %1042  ;;  %v1049_v30 = vadd.f32 %v2564_v36, %v1035_v63  ;;  %v1310_v36 = vadd.f32 %v2558_v34, %v1296_v32 }
 0x18c   : > { %v1048_v11 = vadd.f32 %v2567_v38, %v1034_v7  ;;  %v1066_v38 = vmul.f32 %v2457_v10, %v1065_v2 }
 0x18d   : > { %v1316_v47 = vadd.f32 %v1314_v8, %v1310_v36 }
 0x18e   : > { %v2572_v43 = vpop.permute.xlu1 %1185 }
 0x18f   : > { %v2574_v45 = vpop.permute.xlu0 %1183  ;;  %v1190_v5 = vadd.f32 %v2572_v43, %v1176_v58 }
 0x190   : > { %v1189_v41 = vadd.f32 %v2574_v45, %v1175_v18 }
 0x192   : > { %v2584_v51 = vpop.permute.xlu1 %1326 }
 0x193   : > { %v2588_v53 = vpop.permute.xlu0 %1324  ;;  %v1331_v43 = vadd.f32 %v2584_v51, %v1317_v20 }
 0x194   : > { %v1330_v45 = vadd.f32 %v2588_v53, %v1316_v47 }
 0x196   : > { %v2595_v3 = vpop.permute.xlu1 %1058 }
 0x197   : > { %v2599_v4 = vpop.permute.xlu0 %1056  ;;  %v1063_v42 = vadd.f32 %v2595_v3, %v1049_v30 }
 0x198   : > { %v1062_v31 = vadd.f32 %v2599_v4, %v1048_v11 }
 0x199   : > { %v1069_v46 = vadd.f32 %v1067_v37, %v1063_v42 }
 0x19a   : > { %v2605_v12 = vpop.permute.xlu1 %1199  ;;  %v1068_v4 = vadd.f32 %v1066_v38, %v1062_v31 }
 0x19b   : > { %v2610_v44 = vpop.permute.xlu0 %1197  ;;  %v1204_v3 = vadd.f32 %v2605_v12, %v1190_v5 }
 0x19c   : > { %v1203_v23 = vadd.f32 %v2610_v44, %v1189_v41 }
 0x19d   : > { %v1210_v12 = vadd.f32 %v1208_v19, %v1204_v3 }
 0x19e   : > { %v1341_v52 = vpop.permute.xlu1 %1340  ;;  %v1209_v44 = vadd.f32 %v1207_v1, %v1203_v23 }
 0x19f   : > { %v1339_v21 = vpop.permute.xlu0 %1338  ;;  %v1345_v54 = vadd.f32 %v1341_v52, %v1331_v43 }
 0x1a0   : > { %v1344_v22 = vadd.f32 %v1339_v21, %v1330_v45 }
 0x1a1   : > { %v1351_v52 = vadd.f32 %v1349_v55, %v1345_v54 }
 0x1a2   : > { %v1079_v60 = vpop.permute.xlu1 %1078  ;;  %v1350_v15 = vadd.f32 %v1348_v56, %v1344_v22 }
 0x1a3   : > { %v1077_v6 = vpop.permute.xlu0 %1076  ;;  %v1083_v49 = vadd.f32 %v1079_v60, %v1069_v46 }
 0x1a4   : > { %v1082_v50 = vadd.f32 %v1077_v6, %v1068_v4 }
 0x1a6   : > { %v1220_v26 = vpop.permute.xlu1 %1219 }
 0x1a7   : > { %v1218_v24 = vpop.permute.xlu0 %1217  ;;  %v1224_v51 = vadd.f32 %v1220_v26, %v1210_v12 }
 0x1a8   : > { %v1223_v59 = vadd.f32 %v1218_v24, %v1209_v44 }
 0x1aa   : > { %v1361_v33 = vpop.permute.xlu1 %1360 }
 0x1ab   : > { %v1359_v34 = vpop.permute.xlu0 %1358  ;;  %v1365_v21 = vadd.f32 %v1361_v33, %v1351_v52 }
 0x1ac   : > { %v1364_v60 = vadd.f32 %v1359_v34, %v1350_v15 }
 0x1ae   : > { %v1093_v25 = vpop.permute.xlu1 %1092 }
 0x1af   : > { %v1097_v13 = vadd.f32 %v1093_v25, %v1083_v49  ;;  %v1091_v14 = vpop.permute.xlu0 %1090 }
 0x1b0   : > { %v1096_v57 = vadd.f32 %v1091_v14, %v1082_v50 }
 0x1b1   : > { %1608 = vst.msk [vmem:[%s2213_s8 + $0x58] sm:$0xff] %vm393_vm0, %v1097_v13 }
 0x1b2   : > { %1607 = vst.msk [vmem:[%s2213_s8 + $0x50] sm:$0xff] %vm393_vm0, %v1096_v57  ;;  %v1234_v53 = vpop.permute.xlu1 %1233 }
 0x1b3   : > { %v1238_v35 = vadd.f32 %v1234_v53, %v1224_v51  ;;  %v1232_v0 = vpop.permute.xlu0 %1231 }
 0x1b4   : > { %v1237_v27 = vadd.f32 %v1232_v0, %v1223_v59 }
 0x1b5   : > { %1623 = vst.msk [vmem:[%s2213_s8 + $0x68] sm:$0xff] %vm393_vm0, %v1238_v35 }
 0x1b6   : > { %1622 = vst.msk [vmem:[%s2213_s8 + $0x60] sm:$0xff] %vm393_vm0, %v1237_v27  ;;  %v1375_v10 = vpop.permute.xlu1 %1374 }
 0x1b7   : > { %v1379_v16 = vadd.f32 %v1375_v10, %v1365_v21  ;;  %v1373_v62 = vpop.permute.xlu0 %1372 }
 0x1b8   : > { %v1378_v63 = vadd.f32 %v1373_v62, %v1364_v60 }
 0x1b9   : > { %1638 = vst.msk [vmem:[%s2213_s8 + $0x78] sm:$0xff] %vm393_vm0, %v1379_v16 }
 0x1ba   : > { %1637 = vst.msk [vmem:[%s2213_s8 + $0x70] sm:$0xff] %vm393_vm0, %v1378_v63 }
 0x1bb PF: > { %s18_s17 = sadd.s32 1, %s1843_s17   ;;  %s2704_s12 = smov %s1827_s13 }
 0x1bc   : > { %p15_p6 = scmp.ge.s32.totalorder %s18_s17, 4   ;;  %s2705_s13 = smov %s1831_s14 }
 0x1bd   : > { %s2706_s14 = smov %s1960_s27  ;;  %s2707_s15 = smov %s1839_s16 }
 0x1be   : > { %s2708_s16 = smov %s2710_s28  ;;  %17 = sbr.rel (!%p15_p6) target bundleno = 6 (0x6), region = 92 }
 0x1c3   :  { %1413 = vsyncpa [#allocation3], 1 }
 0x1c4   :  { %1415 = vsyncpa [#allocation3 + $0x1], 1 }
 0x1c5   :  { %1416 = vsyncpa [#allocation4], 1 }
 0x1c6   :  { %1418 = vsyncpa [#allocation4 + $0x1], 1 }
 0x1c7   :  { %1419 = vsyncpa [#allocation5], 1 }
 0x1c8   :  { %1421 = vsyncpa [#allocation5 + $0x1], 1 }

</bundles_post_ra>
